<compile_context>
chip_gen: v5e
topology: v5e:2x2
jax: 0.10.0
libtpu: 0.0.40
codegen_flags: <defaults>
</compile_context>

<pallas_src>
import functools

import jax
import jax.numpy as jnp
import numpy as np
from jax.experimental import pallas as pl
from jax.experimental.pallas import tpu as pltpu

EPS = 1e-5  # nn.BatchNorm3d default


def _round_up(x, m):
    return (x + m - 1) // m * m


# ----------------------------------------------------------------------------
# Pass 1: conv tile (MXU, bf16 in / f32 acc) + bias + per-channel sum / sumsq
# ----------------------------------------------------------------------------
def _conv_stats_kernel(p_ref, w_ref, b_ref, conv_ref, sum_ref, sq_ref,
                       *, tile_m, m_actual, m_padded):
    i = pl.program_id(0)

    h = jnp.dot(p_ref[...], w_ref[...], preferred_element_type=jnp.float32)
    h = h + b_ref[...]                                   # conv bias, f32
    conv_ref[...] = h

    @pl.when(i == 0)
    def _():
        sum_ref[...] = jnp.zeros_like(sum_ref)
        sq_ref[...] = jnp.zeros_like(sq_ref)

    if m_padded > m_actual:  # trace-time branch: only mask if M was padded
        rows = jax.lax.broadcasted_iota(jnp.int32, h.shape, 0) + i * tile_m
        hm = jnp.where(rows < m_actual, h, 0.0)
    else:
        hm = h

    sum_ref[...] += jnp.sum(hm, axis=0, keepdims=True)
    sq_ref[...] += jnp.sum(hm * hm, axis=0, keepdims=True)


# ----------------------------------------------------------------------------
# Pass 2: batchnorm (precomputed per-channel scale/shift) + ReLU
# ----------------------------------------------------------------------------
def _bn_relu_kernel(conv_ref, scale_ref, shift_ref, o_ref):
    h = conv_ref[...] * scale_ref[...] + shift_ref[...]
    o_ref[...] = jnp.maximum(h, 0.0).astype(o_ref.dtype)


# ----------------------------------------------------------------------------
# im2col glue (patches materialized in bf16)
# ----------------------------------------------------------------------------
def _im2col_3d(x, ksize, stride, padding, dilation):
    """x: [N, Cin, D, H, W] -> patches [M, Cin*KD*KH*KW] matching PyTorch weight layout."""
    N, Cin, D, H, W = x.shape
    KD, KH, KW = ksize
    sd, sh, sw = stride
    pd, ph, pw = padding
    dd, dh, dw = dilation

    Do = (D + 2 * pd - dd * (KD - 1) - 1) // sd + 1
    Ho = (H + 2 * ph - dh * (KH - 1) - 1) // sh + 1
    Wo = (W + 2 * pw - dw * (KW - 1) - 1) // sw + 1

    xp = jnp.pad(x, ((0, 0), (0, 0), (pd, pd), (ph, ph), (pw, pw)))

    cols = []
    for kd in range(KD):
        for kh in range(KH):
            for kw in range(KW):
                d0, h0, w0 = kd * dd, kh * dh, kw * dw
                sl = xp[:, :,
                        d0:d0 + (Do - 1) * sd + 1:sd,
                        h0:h0 + (Ho - 1) * sh + 1:sh,
                        w0:w0 + (Wo - 1) * sw + 1:sw]
                cols.append(sl)                            # [N, Cin, Do, Ho, Wo]
    # [N, Cin, Kvol, Do, Ho, Wo]  (Kvol ordered kd,kh,kw — matches PyTorch weight flatten)
    patches = jnp.stack(cols, axis=2)
    # -> [N, Do, Ho, Wo, Cin, Kvol] -> [M, Cin*Kvol]
    patches = patches.transpose(0, 3, 4, 5, 1, 2).reshape(
        N * Do * Ho * Wo, Cin * KD * KH * KW)
    return patches, (Do, Ho, Wo)


@functools.partial(jax.jit, static_argnames=("stride", "padding", "dilation"))
def cnn3d_layer(x, weight, bias, gamma, beta, *, stride=(1, 1, 1),
                padding=(0, 0, 0), dilation=(1, 1, 1)):
    """Forward of CNN3dLayer (Conv3d + BatchNorm3d(train) + ReLU).

    x:      [N, Cin, D, H, W]            (NCDHW, PyTorch convention)
    weight: [Cout, Cin, KD, KH, KW]
    bias, gamma, beta: [Cout]
    returns [N, Cout, Do, Ho, Wo]
    """
    N, Cin, D, H, W = x.shape
    Cout, _, KD, KH, KW = weight.shape

    # im2col, emitted directly in bf16 (MXU-native, halves HBM patch traffic).
    patches, (Do, Ho, Wo) = _im2col_3d(
        x.astype(jnp.bfloat16), (KD, KH, KW), stride, padding, dilation)
    M, K = patches.shape

    # Lane/sublane-dense padding.
    Cp = _round_up(Cout, 128)
    Kp = _round_up(K, 128)
    # 512-row M tile: comfortably within scoped VMEM on v5e/v6e/v7x with K,Cout
    # padded to 128 (per-tile bf16 patches 128 KiB + f32 conv tile 256 KiB).
    TM = 512
    Mp = _round_up(M, TM)
    n_tiles = Mp // TM

    patches_p = jnp.pad(patches, ((0, Mp - M), (0, Kp - K)))
    w_mat = weight.reshape(Cout, K).T.astype(jnp.bfloat16)          # [K, Cout]
    w_p = jnp.pad(w_mat, ((0, Kp - K), (0, Cp - Cout)))
    b_p = jnp.pad(bias.astype(jnp.float32), (0, Cp - Cout)).reshape(1, Cp)
    g_p = jnp.pad(gamma.astype(jnp.float32), (0, Cp - Cout),
                  constant_values=1.0).reshape(1, Cp)
    beta_p = jnp.pad(beta.astype(jnp.float32), (0, Cp - Cout)).reshape(1, Cp)

    # ---------------- pass 1: conv + bias + channel stats ----------------
    kern1 = functools.partial(_conv_stats_kernel,
                              tile_m=TM, m_actual=M, m_padded=Mp)
    conv_flat, ch_sum, ch_sq = pl.pallas_call(
        kern1,
        out_shape=(
            jax.ShapeDtypeStruct((Mp, Cp), jnp.float32),   # conv output (HBM resident)
            jax.ShapeDtypeStruct((1, Cp), jnp.float32),    # per-channel sum
            jax.ShapeDtypeStruct((1, Cp), jnp.float32),    # per-channel sum of squares
        ),
        grid=(n_tiles,),
        in_specs=[
            pl.BlockSpec((TM, Kp), lambda i: (i, 0)),      # patches tile (bf16)
            pl.BlockSpec((Kp, Cp), lambda i: (0, 0)),      # weight (bf16, resident)
            pl.BlockSpec((1, Cp), lambda i: (0, 0)),       # bias (f32)
        ],
        out_specs=(
            pl.BlockSpec((TM, Cp), lambda i: (i, 0)),
            pl.BlockSpec((1, Cp), lambda i: (0, 0)),       # accumulator (constant index)
            pl.BlockSpec((1, Cp), lambda i: (0, 0)),       # accumulator (constant index)
        ),
        compiler_params=pltpu.CompilerParams(
            dimension_semantics=("arbitrary",)),           # stats reduction over M tiles
    )(patches_p, w_p, b_p)

    # Tiny per-channel math outside the kernel: biased batch stats -> scale/shift.
    inv_count = jnp.float32(1.0 / M)
    mean = ch_sum * inv_count
    var = jnp.maximum(ch_sq * inv_count - mean * mean, 0.0)   # clamp fp rounding
    scale = g_p * jax.lax.rsqrt(var + EPS)
    shift = beta_p - mean * scale

    # ---------------- pass 2: normalize + ReLU (parallel over M tiles) ----------------
    out_flat = pl.pallas_call(
        _bn_relu_kernel,
        out_shape=jax.ShapeDtypeStruct((Mp, Cp), jnp.float32),
        grid=(n_tiles,),
        in_specs=[
            pl.BlockSpec((TM, Cp), lambda i: (i, 0)),
            pl.BlockSpec((1, Cp), lambda i: (0, 0)),
            pl.BlockSpec((1, Cp), lambda i: (0, 0)),
        ],
        out_specs=pl.BlockSpec((TM, Cp), lambda i: (i, 0)),
        compiler_params=pltpu.CompilerParams(
            dimension_semantics=("parallel",)),            # shards across TCs on v7x
    )(conv_flat, scale, shift)

    # [Mp, Cp] -> slice valid -> [N, Do, Ho, Wo, Cout] -> NCDHW
    out = out_flat[:M, :Cout].reshape(N, Do, Ho, Wo, Cout).transpose(0, 4, 1, 2, 3)
    return out.astype(x.dtype)


# ----------------------------------------------------------------------------
# Pure-JAX f32 reference (for correctness check)
# ----------------------------------------------------------------------------
def _reference(x, weight, bias, gamma, beta, stride, padding, dilation):
    dn = jax.lax.conv_dimension_numbers(x.shape, weight.shape,
                                        ("NCDHW", "OIDHW", "NCDHW"))
    conv = jax.lax.conv_general_dilated(
        x, weight, window_strides=stride,
        padding=[(p, p) for p in padding],
        rhs_dilation=dilation, dimension_numbers=dn,
        precision=jax.lax.Precision.HIGHEST)
    conv = conv + bias.reshape(1, -1, 1, 1, 1)
    mean = conv.mean(axis=(0, 2, 3, 4), keepdims=True)
    var = ((conv - mean) ** 2).mean(axis=(0, 2, 3, 4), keepdims=True)
    xhat = (conv - mean) / jnp.sqrt(var + EPS)
    bn = gamma.reshape(1, -1, 1, 1, 1) * xhat + beta.reshape(1, -1, 1, 1, 1)
    return jnp.maximum(bn, 0.0)


if __name__ == "__main__":
    # Small shapes: batch=2, in_channels=4, out_channels=8, spatial 8^3, kernel 3, pad 1.
    N, Cin, Cout = 2, 4, 8
    D = H = W = 8
    KD = KH = KW = 3
    stride, padding, dilation = (1, 1, 1), (1, 1, 1), (1, 1, 1)

    key = jax.random.PRNGKey(0)
    kx, kw, kb, kg, kbt = jax.random.split(key, 5)

    x = jax.random.normal(kx, (N, Cin, D, H, W), dtype=jnp.float32)
    # Deterministic synthetic parameters (shapes per nn.Conv3d / nn.BatchNorm3d).
    weight = 0.1 * jax.random.normal(kw, (Cout, Cin, KD, KH, KW), dtype=jnp.float32)
    bias = 0.1 * jax.random.normal(kb, (Cout,), dtype=jnp.float32)
    gamma = 1.0 + 0.1 * jax.random.normal(kg, (Cout,), dtype=jnp.float32)
    beta = 0.1 * jax.random.normal(kbt, (Cout,), dtype=jnp.float32)

    out = cnn3d_layer(x, weight, bias, gamma, beta,
                      stride=stride, padding=padding, dilation=dilation)
    out = jax.block_until_ready(out)

    ref = _reference(x, weight, bias, gamma, beta, stride, padding, dilation)
    # Looser tolerance than the pure-f32 version: the MXU matmul consumes bf16
    # inputs (f32 accumulation), worth ~0.3% relative error on the conv output.
    np.testing.assert_allclose(np.asarray(out), np.asarray(ref), rtol=2e-2, atol=2e-2)

    print("KERNEL_OK")
</pallas_src>

<mosaic_0001>
module attributes {stable_mosaic.version = 11 : i64} {
  func.func @_conv_stats_kernel(%arg0: i32, %arg1: memref<512x128xbf16, #tpu.memory_space<vmem>>, %arg2: memref<128x128xbf16, #tpu.memory_space<vmem>>, %arg3: memref<1x128xf32, #tpu.memory_space<vmem>>, %arg4: memref<512x128xf32, #tpu.memory_space<vmem>>, %arg5: memref<1x128xf32, #tpu.memory_space<vmem>>, %arg6: memref<1x128xf32, #tpu.memory_space<vmem>>) attributes {dimension_semantics = [#tpu.dimension_semantics<arbitrary>], iteration_bounds = array<i64: 2>, scalar_prefetch = 0 : i64, scratch_operands = 0 : i64, tpu.core_type = #tpu.core_type<tc>, window_params = [{transform_indices = @transform_0, window_bounds = array<i64: 512, 128>}, {pipeline_mode = #tpu.pipeline_mode<synchronous>, transform_indices = @transform_1, window_bounds = array<i64: 128, 128>}, {pipeline_mode = #tpu.pipeline_mode<synchronous>, transform_indices = @transform_2, window_bounds = array<i64: 1, 128>}, {transform_indices = @transform_3, window_bounds = array<i64: 512, 128>}, {pipeline_mode = #tpu.pipeline_mode<synchronous>, transform_indices = @transform_4, window_bounds = array<i64: 1, 128>}, {pipeline_mode = #tpu.pipeline_mode<synchronous>, transform_indices = @transform_5, window_bounds = array<i64: 1, 128>}]} {
    %c0 = arith.constant 0 : index
    %c0_0 = arith.constant 0 : index
    %0 = vector.load %arg1[%c0, %c0_0] : memref<512x128xbf16, #tpu.memory_space<vmem>>, vector<512x128xbf16>
    %c0_1 = arith.constant 0 : index
    %c0_2 = arith.constant 0 : index
    %1 = vector.load %arg2[%c0_1, %c0_2] : memref<128x128xbf16, #tpu.memory_space<vmem>>, vector<128x128xbf16>
    %cst = arith.constant dense<0.000000e+00> : vector<512x128xf32>
    %2 = tpu.matmul %0, %1, %cst {dimension_numbers = #tpu.dot_dimension_numbers<[1], [0], [0], [1], [0, 0, 1, 1], [], []>} : vector<512x128xbf16>, vector<128x128xbf16>, vector<512x128xf32> -> vector<512x128xf32>
    %c0_3 = arith.constant 0 : index
    %c0_4 = arith.constant 0 : index
    %3 = vector.load %arg3[%c0_3, %c0_4] : memref<1x128xf32, #tpu.memory_space<vmem>>, vector<1x128xf32>
    %4 = vector.broadcast %3 : vector<1x128xf32> to vector<512x128xf32>
    %5 = arith.addf %2, %4 : vector<512x128xf32>
    %c0_5 = arith.constant 0 : index
    %c0_6 = arith.constant 0 : index
    %6 = vector.load %arg4[%c0_5, %c0_6] : memref<512x128xf32, #tpu.memory_space<vmem>>, vector<512x128xf32>
    tpu.vector_store %arg4[%c0_5, %c0_6], %5 {strides = array<i32>} : memref<512x128xf32, #tpu.memory_space<vmem>>, vector<512x128xf32>,
    %c0_i32 = arith.constant 0 : i32
    %7 = arith.cmpi eq, %arg0, %c0_i32 : i32
    %8 = arith.extui %7 : i1 to i32
    %c0_i32_7 = arith.constant 0 : i32
    %9 = arith.cmpi ne, %8, %c0_i32_7 : i32
    scf.if %9 {
      %cst_18 = arith.constant 0.000000e+00 : f32
      %21 = vector.broadcast %cst_18 : f32 to vector<1x128xf32>
      %c0_19 = arith.constant 0 : index
      %c0_20 = arith.constant 0 : index
      %22 = vector.load %arg5[%c0_19, %c0_20] : memref<1x128xf32, #tpu.memory_space<vmem>>, vector<1x128xf32>
      tpu.vector_store %arg5[%c0_19, %c0_20], %21 {strides = array<i32>} : memref<1x128xf32, #tpu.memory_space<vmem>>, vector<1x128xf32>,
      %cst_21 = arith.constant 0.000000e+00 : f32
      %23 = vector.broadcast %cst_21 : f32 to vector<1x128xf32>
      %c0_22 = arith.constant 0 : index
      %c0_23 = arith.constant 0 : index
      %24 = vector.load %arg6[%c0_22, %c0_23] : memref<1x128xf32, #tpu.memory_space<vmem>>, vector<1x128xf32>
      tpu.vector_store %arg6[%c0_22, %c0_23], %23 {strides = array<i32>} : memref<1x128xf32, #tpu.memory_space<vmem>>, vector<1x128xf32>,
    } else {
    }
    %c0_8 = arith.constant 0 : index
    %c0_9 = arith.constant 0 : index
    %10 = vector.load %arg5[%c0_8, %c0_9] : memref<1x128xf32, #tpu.memory_space<vmem>>, vector<1x128xf32>
    %cst_10 = arith.constant dense<0.000000e+00> : vector<128xf32>
    %11 = vector.multi_reduction <add>, %5, %cst_10 [0] : vector<512x128xf32> to vector<128xf32>
    %12 = vector.shape_cast %11 : vector<128xf32> to vector<1x128xf32>
    %13 = arith.addf %10, %12 : vector<1x128xf32>
    %c0_11 = arith.constant 0 : index
    %c0_12 = arith.constant 0 : index
    %14 = vector.load %arg5[%c0_11, %c0_12] : memref<1x128xf32, #tpu.memory_space<vmem>>, vector<1x128xf32>
    tpu.vector_store %arg5[%c0_11, %c0_12], %13 {strides = array<i32>} : memref<1x128xf32, #tpu.memory_space<vmem>>, vector<1x128xf32>,
    %c0_13 = arith.constant 0 : index
    %c0_14 = arith.constant 0 : index
    %15 = vector.load %arg6[%c0_13, %c0_14] : memref<1x128xf32, #tpu.memory_space<vmem>>, vector<1x128xf32>
    %16 = arith.mulf %5, %5 : vector<512x128xf32>
    %cst_15 = arith.constant dense<0.000000e+00> : vector<128xf32>
    %17 = vector.multi_reduction <add>, %16, %cst_15 [0] : vector<512x128xf32> to vector<128xf32>
    %18 = vector.shape_cast %17 : vector<128xf32> to vector<1x128xf32>
    %19 = arith.addf %15, %18 : vector<1x128xf32>
    %c0_16 = arith.constant 0 : index
    %c0_17 = arith.constant 0 : index
    %20 = vector.load %arg6[%c0_16, %c0_17] : memref<1x128xf32, #tpu.memory_space<vmem>>, vector<1x128xf32>
    tpu.vector_store %arg6[%c0_16, %c0_17], %19 {strides = array<i32>} : memref<1x128xf32, #tpu.memory_space<vmem>>, vector<1x128xf32>,
    return
  }
  func.func @transform_0(%arg0: i32) -> (i32, i32) {
    %c0_i32 = arith.constant 0 : i32
    %c0_i32_0 = arith.constant 0 : i32
    return %arg0, %c0_i32 : i32, i32
  }
  func.func @transform_1(%arg0: i32) -> (i32, i32) {
    %c0_i32 = arith.constant 0 : i32
    %c0_i32_0 = arith.constant 0 : i32
    %c0_i32_1 = arith.constant 0 : i32
    return %c0_i32, %c0_i32_0 : i32, i32
  }
  func.func @transform_2(%arg0: i32) -> (i32, i32) {
    %c0_i32 = arith.constant 0 : i32
    %c0_i32_0 = arith.constant 0 : i32
    %c0_i32_1 = arith.constant 0 : i32
    return %c0_i32, %c0_i32_0 : i32, i32
  }
  func.func @transform_3(%arg0: i32) -> (i32, i32) {
    %c0_i32 = arith.constant 0 : i32
    %c0_i32_0 = arith.constant 0 : i32
    return %arg0, %c0_i32 : i32, i32
  }
  func.func @transform_4(%arg0: i32) -> (i32, i32) {
    %c0_i32 = arith.constant 0 : i32
    %c0_i32_0 = arith.constant 0 : i32
    %c0_i32_1 = arith.constant 0 : i32
    return %c0_i32, %c0_i32_0 : i32, i32
  }
  func.func @transform_5(%arg0: i32) -> (i32, i32) {
    %c0_i32 = arith.constant 0 : i32
    %c0_i32_0 = arith.constant 0 : i32
    %c0_i32_1 = arith.constant 0 : i32
    return %c0_i32, %c0_i32_0 : i32, i32
  }
}

module attributes {stable_mosaic.version = 11 : i64} {
  func.func @_bn_relu_kernel(%arg0: i32, %arg1: memref<512x128xf32, #tpu.memory_space<vmem>>, %arg2: memref<1x128xf32, #tpu.memory_space<vmem>>, %arg3: memref<1x128xf32, #tpu.memory_space<vmem>>, %arg4: memref<512x128xf32, #tpu.memory_space<vmem>>) attributes {dimension_semantics = [#tpu.dimension_semantics<parallel>], iteration_bounds = array<i64: 2>, scalar_prefetch = 0 : i64, scratch_operands = 0 : i64, tpu.core_type = #tpu.core_type<tc>, window_params = [{transform_indices = @transform_0, window_bounds = array<i64: 512, 128>}, {pipeline_mode = #tpu.pipeline_mode<synchronous>, transform_indices = @transform_1, window_bounds = array<i64: 1, 128>}, {pipeline_mode = #tpu.pipeline_mode<synchronous>, transform_indices = @transform_2, window_bounds = array<i64: 1, 128>}, {transform_indices = @transform_3, window_bounds = array<i64: 512, 128>}]} {
    %c0 = arith.constant 0 : index
    %c0_0 = arith.constant 0 : index
    %0 = vector.load %arg1[%c0, %c0_0] : memref<512x128xf32, #tpu.memory_space<vmem>>, vector<512x128xf32>
    %c0_1 = arith.constant 0 : index
    %c0_2 = arith.constant 0 : index
    %1 = vector.load %arg2[%c0_1, %c0_2] : memref<1x128xf32, #tpu.memory_space<vmem>>, vector<1x128xf32>
    %2 = vector.broadcast %1 : vector<1x128xf32> to vector<512x128xf32>
    %3 = arith.mulf %0, %2 : vector<512x128xf32>
    %c0_3 = arith.constant 0 : index
    %c0_4 = arith.constant 0 : index
    %4 = vector.load %arg3[%c0_3, %c0_4] : memref<1x128xf32, #tpu.memory_space<vmem>>, vector<1x128xf32>
    %5 = vector.broadcast %4 : vector<1x128xf32> to vector<512x128xf32>
    %6 = arith.addf %3, %5 : vector<512x128xf32>
    %cst = arith.constant 0.000000e+00 : f32
    %7 = vector.broadcast %cst : f32 to vector<512x128xf32>
    %8 = arith.maximumf %6, %7 : vector<512x128xf32>
    %c0_5 = arith.constant 0 : index
    %c0_6 = arith.constant 0 : index
    %9 = vector.load %arg4[%c0_5, %c0_6] : memref<512x128xf32, #tpu.memory_space<vmem>>, vector<512x128xf32>
    tpu.vector_store %arg4[%c0_5, %c0_6], %8 {strides = array<i32>} : memref<512x128xf32, #tpu.memory_space<vmem>>, vector<512x128xf32>,
    return
  }
  func.func @transform_0(%arg0: i32) -> (i32, i32) {
    %c0_i32 = arith.constant 0 : i32
    %c0_i32_0 = arith.constant 0 : i32
    return %arg0, %c0_i32 : i32, i32
  }
  func.func @transform_1(%arg0: i32) -> (i32, i32) {
    %c0_i32 = arith.constant 0 : i32
    %c0_i32_0 = arith.constant 0 : i32
    %c0_i32_1 = arith.constant 0 : i32
    return %c0_i32, %c0_i32_0 : i32, i32
  }
  func.func @transform_2(%arg0: i32) -> (i32, i32) {
    %c0_i32 = arith.constant 0 : i32
    %c0_i32_0 = arith.constant 0 : i32
    %c0_i32_1 = arith.constant 0 : i32
    return %c0_i32, %c0_i32_0 : i32, i32
  }
  func.func @transform_3(%arg0: i32) -> (i32, i32) {
    %c0_i32 = arith.constant 0 : i32
    %c0_i32_0 = arith.constant 0 : i32
    return %arg0, %c0_i32 : i32, i32
  }
}

</mosaic_0001>

<bundles_post_ra>
// kernel: cnn3d_layer.3
= control target key start
LH: loop header
LB: loop body
LE: loop exit
PB: predicated region body
PF: predicated region fallthrough
CT: control target
= control target key end

     0   :  { %s607_s12 = smov 0   ;;  %s897_s0 = inlined_call_operand.vmem [shape: f32[1024,128], index: 0, kind: input, shape index: {}]   ;;  %s898_s1 = inlined_call_operand.vmem [shape: f32[1,128], index: 1, kind: input, shape index: {}]   ;;  %s899_s2 = inlined_call_operand.vmem [shape: f32[1,128], index: 2, kind: input, shape index: {}]   ;;  %s900_s3 = inlined_call_operand.vmem [shape: f32[1024,128], index: 3, kind: output, shape index: {}]  }
   0x1 LB: > { %s558_s13 = sadd.s32 4294967295, %s585_s12   ;;  %p562_p0 = scmp.ge.s32.totalorder %s585_s12, 1  ;;  %s585_s12 = sphi %s607_s12, %s13_s12  }
   0x2   : > { %p138_p1 = scmp.lt.s32.totalorder %s585_s12, 3 }
   0x4   : > { %p139_p2 = pnand %p562_p0, %p138_p1 }
   0x5   : > { %s563_s14 = sshll.u32 (!%p139_p2), %s558_s13, 6 }
   0x6   : > { %142 = sbr.rel (%p139_p2) target bundleno = 85 (0x55), region = 32  ;;  %p163_p3 = scmp.lt.s32.totalorder (!%p139_p2), %s563_s14, 127 }
   0xb   : > { %s902_s14 = smov (!%p163_p3, %s563_s14), 127  ;;  %v618_v0 = vld [vmem:[%s898_s1] ss:$0 sm:$0xff] }
   0xc   : > { %s564_s17 = sshll.u32 %s902_s14, 3  ;;  %v628_v1 = vld [vmem:[%s899_s2] ss:$0 sm:$0xff] }
   0xd   : > { %s623_s20 = scalar_lea.vmem %s897_s0, %s564_s17  ;;  %s651_s25 = scalar_lea.vmem %s900_s3, %s564_s17 }
   0xe   : > { %v174_v2 = vld [vmem:[%s623_s20] sm:$0xff]  ;;  %v175_v3 = vld [vmem:[%s623_s20 + $0x8] sm:$0xff]  ;;  %v176_v4 = vld [vmem:[%s623_s20 + $0x10] sm:$0xff] }
   0xf   : > { %v242_v5 = vmul.f32 %v618_v0, %v174_v2  ;;  %v243_v6 = vmul.f32 %v618_v0, %v175_v3  ;;  %v244_v7 = vmul.f32 %v618_v0, %v176_v4  ;;  %v177_v8 = vld [vmem:[%s623_s20 + $0x18] sm:$0xff]  ;;  %v178_v9 = vld [vmem:[%s623_s20 + $0x20] sm:$0xff]  ;;  %v179_v10 = vld [vmem:[%s623_s20 + $0x28] sm:$0xff] }
  0x10   : > { %v245_v11 = vmul.f32 %v618_v0, %v177_v8  ;;  %v246_v12 = vmul.f32 %v618_v0, %v178_v9  ;;  %v247_v13 = vmul.f32 %v618_v0, %v179_v10  ;;  %v180_v14 = vld [vmem:[%s623_s20 + $0x30] sm:$0xff]  ;;  %v181_v15 = vld [vmem:[%s623_s20 + $0x38] sm:$0xff]  ;;  %v182_v24 = vld [vmem:[%s623_s20 + $0x40] sm:$0xff] }
  0x11   : > { %v310_v16 = vadd.f32 %v628_v1, %v242_v5  ;;  %v311_v17 = vadd.f32 %v628_v1, %v243_v6  ;;  %v312_v18 = vadd.f32 %v628_v1, %v244_v7  ;;  %v248_v19 = vmul.f32 %v618_v0, %v180_v14  ;;  %v183_v25 = vld [vmem:[%s623_s20 + $0x48] sm:$0xff]  ;;  %v184_v26 = vld [vmem:[%s623_s20 + $0x50] sm:$0xff]  ;;  %v185_v31 = vld [vmem:[%s623_s20 + $0x58] sm:$0xff] }
  0x12   : > { %v313_v20 = vadd.f32 %v628_v1, %v245_v11  ;;  %v314_v21 = vadd.f32 %v628_v1, %v246_v12  ;;  %v315_v22 = vadd.f32 %v628_v1, %v247_v13  ;;  %v249_v23 = vmul.f32 %v618_v0, %v181_v15  ;;  %v186_v32 = vld [vmem:[%s623_s20 + $0x60] sm:$0xff]  ;;  %v187_v33 = vld [vmem:[%s623_s20 + $0x68] sm:$0xff]  ;;  %v188_v37 = vld [vmem:[%s623_s20 + $0x70] sm:$0xff] }
  0x13   : > { %v374_v27 = vmax.f32 %v310_v16, 0.0  ;;  %v375_v28 = vmax.f32 %v311_v17, 0.0  ;;  %v376_v29 = vmax.f32 %v312_v18, 0.0  ;;  %v316_v30 = vadd.f32 %v628_v1, %v248_v19  ;;  %v189_v42 = vld [vmem:[%s623_s20 + $0x78] sm:$0xff]  ;;  %v190_v54 = vld [vmem:[%s623_s20 + $0x80] sm:$0xff]  ;;  %v191_v55 = vld [vmem:[%s623_s20 + $0x88] sm:$0xff] }
  0x14   : > { %v377_v34 = vmax.f32 %v313_v20, 0.0  ;;  %v378_v35 = vmax.f32 %v314_v21, 0.0  ;;  %v317_v36 = vadd.f32 %v628_v1, %v249_v23  ;;  %v379_v38 = vmax.f32 %v315_v22, 0.0  ;;  %v192_v56 = vld [vmem:[%s623_s20 + $0x90] sm:$0xff]  ;;  %v193_v59 = vld [vmem:[%s623_s20 + $0x98] sm:$0xff]  ;;  %v194_v63 = vld [vmem:[%s623_s20 + $0xa0] sm:$0xff] }
  0x15   : > { %438 = vst [vmem:[%s651_s25] sm:$0xff] %v374_v27  ;;  %v250_v39 = vmul.f32 %v618_v0, %v182_v24  ;;  %v251_v40 = vmul.f32 %v618_v0, %v183_v25  ;;  %v252_v41 = vmul.f32 %v618_v0, %v184_v26  ;;  %v380_v43 = vmax.f32 %v316_v30, 0.0  ;;  %v195_v6 = vld [vmem:[%s623_s20 + $0xa8] sm:$0xff]  ;;  %v196_v10 = vld [vmem:[%s623_s20 + $0xb0] sm:$0xff]  ;;  %v197_v14 = vld [vmem:[%s623_s20 + $0xb8] sm:$0xff] }
  0x16   : > { %439 = vst [vmem:[%s651_s25 + $0x8] sm:$0xff] %v375_v28  ;;  %v253_v44 = vmul.f32 %v618_v0, %v185_v31  ;;  %v254_v45 = vmul.f32 %v618_v0, %v186_v32  ;;  %v255_v46 = vmul.f32 %v618_v0, %v187_v33  ;;  %v256_v50 = vmul.f32 %v618_v0, %v188_v37  ;;  %v198_v18 = vld [vmem:[%s623_s20 + $0xc0] sm:$0xff]  ;;  %v199_v22 = vld [vmem:[%s623_s20 + $0xc8] sm:$0xff]  ;;  %v200_v26 = vld [vmem:[%s623_s20 + $0xd0] sm:$0xff] }
  0x17   : > { %440 = vst [vmem:[%s651_s25 + $0x10] sm:$0xff] %v376_v29  ;;  %v318_v47 = vadd.f32 %v628_v1, %v250_v39  ;;  %v319_v48 = vadd.f32 %v628_v1, %v251_v40  ;;  %v320_v49 = vadd.f32 %v628_v1, %v252_v41  ;;  %v381_v51 = vmax.f32 %v317_v36, 0.0  ;;  %v201_v30 = vld [vmem:[%s623_s20 + $0xd8] sm:$0xff] }
  0x18   : > { %441 = vst [vmem:[%s651_s25 + $0x18] sm:$0xff] %v377_v34  ;;  %v321_v52 = vadd.f32 %v628_v1, %v253_v44  ;;  %v257_v53 = vmul.f32 %v618_v0, %v189_v42  ;;  %v322_v58 = vadd.f32 %v628_v1, %v254_v45  ;;  %v323_v62 = vadd.f32 %v628_v1, %v255_v46  ;;  %v202_v34 = vld [vmem:[%s623_s20 + $0xe0] sm:$0xff]  ;;  %v204_v42 = vld [vmem:[%s623_s20 + $0xf0] sm:$0xff]  ;;  %v205_v46 = vld [vmem:[%s623_s20 + $0xf8] sm:$0xff] }
  0x19   : > { %442 = vst [vmem:[%s651_s25 + $0x20] sm:$0xff] %v378_v35  ;;  %v382_v57 = vmax.f32 %v318_v47, 0.0  ;;  %v383_v60 = vmax.f32 %v319_v48, 0.0  ;;  %v384_v61 = vmax.f32 %v320_v49, 0.0  ;;  %v324_v2 = vadd.f32 %v628_v1, %v256_v50  ;;  %v206_v50 = vld [vmem:[%s623_s20 + $0x100] sm:$0xff] }
  0x1a   : > { %443 = vst [vmem:[%s651_s25 + $0x28] sm:$0xff] %v379_v38  ;;  %v258_v3 = vmul.f32 %v618_v0, %v190_v54  ;;  %v259_v4 = vmul.f32 %v618_v0, %v191_v55  ;;  %v260_v5 = vmul.f32 %v618_v0, %v192_v56  ;;  %v385_v7 = vmax.f32 %v321_v52, 0.0  ;;  %v203_v38 = vld [vmem:[%s623_s20 + $0xe8] sm:$0xff] }
  0x1b   : > { %444 = vst [vmem:[%s651_s25 + $0x30] sm:$0xff] %v380_v43  ;;  %v325_v8 = vadd.f32 %v628_v1, %v257_v53  ;;  %v261_v9 = vmul.f32 %v618_v0, %v193_v59  ;;  %v386_v11 = vmax.f32 %v322_v58, 0.0  ;;  %v262_v13 = vmul.f32 %v618_v0, %v194_v63  ;;  %v207_v54 = vld [vmem:[%s623_s20 + $0x108] sm:$0xff]  ;;  %v208_v58 = vld [vmem:[%s623_s20 + $0x110] sm:$0xff] }
  0x1c   : > { %445 = vst [vmem:[%s651_s25 + $0x38] sm:$0xff] %v381_v51  ;;  %v326_v12 = vadd.f32 %v628_v1, %v258_v3  ;;  %v387_v15 = vmax.f32 %v323_v62, 0.0  ;;  %v327_v16 = vadd.f32 %v628_v1, %v259_v4  ;;  %v263_v17 = vmul.f32 %v618_v0, %v195_v6  ;;  %v209_v62 = vld [vmem:[%s623_s20 + $0x118] sm:$0xff]  ;;  %v210_v4 = vld [vmem:[%s623_s20 + $0x120] sm:$0xff] }
  0x1d   : > { %446 = vst [vmem:[%s651_s25 + $0x40] sm:$0xff] %v382_v57  ;;  %v388_v19 = vmax.f32 %v324_v2, 0.0  ;;  %v328_v20 = vadd.f32 %v628_v1, %v260_v5  ;;  %v264_v21 = vmul.f32 %v618_v0, %v196_v10  ;;  %v389_v23 = vmax.f32 %v325_v8, 0.0  ;;  %v211_v8 = vld [vmem:[%s623_s20 + $0x128] sm:$0xff] }
  0x1e   : > { %447 = vst [vmem:[%s651_s25 + $0x48] sm:$0xff] %v383_v60  ;;  %v329_v24 = vadd.f32 %v628_v1, %v261_v9  ;;  %v265_v25 = vmul.f32 %v618_v0, %v197_v14  ;;  %v390_v27 = vmax.f32 %v326_v12, 0.0  ;;  %v330_v28 = vadd.f32 %v628_v1, %v262_v13  ;;  %v212_v12 = vld [vmem:[%s623_s20 + $0x130] sm:$0xff] }
  0x1f   : > { %448 = vst [vmem:[%s651_s25 + $0x50] sm:$0xff] %v384_v61  ;;  %v266_v29 = vmul.f32 %v618_v0, %v198_v18  ;;  %v391_v31 = vmax.f32 %v327_v16, 0.0  ;;  %v331_v32 = vadd.f32 %v628_v1, %v263_v17  ;;  %v267_v33 = vmul.f32 %v618_v0, %v199_v22  ;;  %v213_v16 = vld [vmem:[%s623_s20 + $0x138] sm:$0xff] }
  0x20   : > { %449 = vst [vmem:[%s651_s25 + $0x58] sm:$0xff] %v385_v7  ;;  %v392_v35 = vmax.f32 %v328_v20, 0.0  ;;  %v332_v36 = vadd.f32 %v628_v1, %v264_v21  ;;  %v268_v37 = vmul.f32 %v618_v0, %v200_v26  ;;  %v393_v39 = vmax.f32 %v329_v24, 0.0  ;;  %v214_v20 = vld [vmem:[%s623_s20 + $0x140] sm:$0xff]  ;;  %v215_v24 = vld [vmem:[%s623_s20 + $0x148] sm:$0xff] }
  0x21   : > { %450 = vst [vmem:[%s651_s25 + $0x60] sm:$0xff] %v386_v11  ;;  %v333_v40 = vadd.f32 %v628_v1, %v265_v25  ;;  %v269_v41 = vmul.f32 %v618_v0, %v201_v30  ;;  %v394_v43 = vmax.f32 %v330_v28, 0.0  ;;  %v334_v44 = vadd.f32 %v628_v1, %v266_v29  ;;  %v216_v28 = vld [vmem:[%s623_s20 + $0x150] sm:$0xff] }
  0x22   : > { %451 = vst [vmem:[%s651_s25 + $0x68] sm:$0xff] %v387_v15  ;;  %v270_v45 = vmul.f32 %v618_v0, %v202_v34  ;;  %v395_v47 = vmax.f32 %v331_v32, 0.0  ;;  %v335_v48 = vadd.f32 %v628_v1, %v267_v33  ;;  %v271_v49 = vmul.f32 %v618_v0, %v203_v38  ;;  %v217_v32 = vld [vmem:[%s623_s20 + $0x158] sm:$0xff] }
  0x23   : > { %452 = vst [vmem:[%s651_s25 + $0x70] sm:$0xff] %v388_v19  ;;  %v396_v51 = vmax.f32 %v332_v36, 0.0  ;;  %v336_v52 = vadd.f32 %v628_v1, %v268_v37  ;;  %v272_v53 = vmul.f32 %v618_v0, %v204_v42  ;;  %v397_v55 = vmax.f32 %v333_v40, 0.0  ;;  %v218_v36 = vld [vmem:[%s623_s20 + $0x160] sm:$0xff]  ;;  %v219_v40 = vld [vmem:[%s623_s20 + $0x168] sm:$0xff] }
  0x24   : > { %453 = vst [vmem:[%s651_s25 + $0x78] sm:$0xff] %v389_v23  ;;  %v337_v56 = vadd.f32 %v628_v1, %v269_v41  ;;  %v273_v57 = vmul.f32 %v618_v0, %v205_v46  ;;  %v398_v59 = vmax.f32 %v334_v44, 0.0  ;;  %v338_v60 = vadd.f32 %v628_v1, %v270_v45  ;;  %v220_v44 = vld [vmem:[%s623_s20 + $0x170] sm:$0xff] }
  0x25   : > { %454 = vst [vmem:[%s651_s25 + $0x80] sm:$0xff] %v390_v27  ;;  %v274_v61 = vmul.f32 %v618_v0, %v206_v50  ;;  %v399_v63 = vmax.f32 %v335_v48, 0.0  ;;  %v339_v2 = vadd.f32 %v628_v1, %v271_v49  ;;  %v275_v3 = vmul.f32 %v618_v0, %v207_v54  ;;  %v221_v48 = vld [vmem:[%s623_s20 + $0x178] sm:$0xff] }
  0x26   : > { %455 = vst [vmem:[%s651_s25 + $0x88] sm:$0xff] %v391_v31  ;;  %v400_v5 = vmax.f32 %v336_v52, 0.0  ;;  %v340_v6 = vadd.f32 %v628_v1, %v272_v53  ;;  %v276_v7 = vmul.f32 %v618_v0, %v208_v58  ;;  %v401_v9 = vmax.f32 %v337_v56, 0.0  ;;  %v222_v52 = vld [vmem:[%s623_s20 + $0x180] sm:$0xff]  ;;  %v223_v56 = vld [vmem:[%s623_s20 + $0x188] sm:$0xff] }
  0x27   : > { %456 = vst [vmem:[%s651_s25 + $0x90] sm:$0xff] %v392_v35  ;;  %v341_v10 = vadd.f32 %v628_v1, %v273_v57  ;;  %v277_v11 = vmul.f32 %v618_v0, %v209_v62  ;;  %v402_v13 = vmax.f32 %v338_v60, 0.0  ;;  %v342_v14 = vadd.f32 %v628_v1, %v274_v61  ;;  %v224_v60 = vld [vmem:[%s623_s20 + $0x190] sm:$0xff] }
  0x28   : > { %457 = vst [vmem:[%s651_s25 + $0x98] sm:$0xff] %v393_v39  ;;  %v278_v15 = vmul.f32 %v618_v0, %v210_v4  ;;  %v403_v17 = vmax.f32 %v339_v2, 0.0  ;;  %v343_v18 = vadd.f32 %v628_v1, %v275_v3  ;;  %v279_v19 = vmul.f32 %v618_v0, %v211_v8  ;;  %v225_v2 = vld [vmem:[%s623_s20 + $0x198] sm:$0xff] }
  0x29   : > { %458 = vst [vmem:[%s651_s25 + $0xa0] sm:$0xff] %v394_v43  ;;  %v404_v21 = vmax.f32 %v340_v6, 0.0  ;;  %v344_v22 = vadd.f32 %v628_v1, %v276_v7  ;;  %v280_v23 = vmul.f32 %v618_v0, %v212_v12  ;;  %v405_v25 = vmax.f32 %v341_v10, 0.0  ;;  %v237_v3 = vld [vmem:[%s623_s20 + $0x1f8] sm:$0xff]  ;;  %v226_v7 = vld [vmem:[%s623_s20 + $0x1a0] sm:$0xff] }
  0x2a   : > { %459 = vst [vmem:[%s651_s25 + $0xa8] sm:$0xff] %v395_v47  ;;  %v345_v26 = vadd.f32 %v628_v1, %v277_v11  ;;  %v281_v27 = vmul.f32 %v618_v0, %v213_v16  ;;  %v406_v29 = vmax.f32 %v342_v14, 0.0  ;;  %v346_v30 = vadd.f32 %v628_v1, %v278_v15  ;;  %v227_v11 = vld [vmem:[%s623_s20 + $0x1a8] sm:$0xff]  ;;  %v228_v15 = vld [vmem:[%s623_s20 + $0x1b0] sm:$0xff] }
  0x2b   : > { %460 = vst [vmem:[%s651_s25 + $0xb0] sm:$0xff] %v396_v51  ;;  %v282_v31 = vmul.f32 %v618_v0, %v214_v20  ;;  %v407_v33 = vmax.f32 %v343_v18, 0.0  ;;  %v347_v34 = vadd.f32 %v628_v1, %v279_v19  ;;  %v283_v35 = vmul.f32 %v618_v0, %v215_v24  ;;  %v229_v20 = vld [vmem:[%s623_s20 + $0x1b8] sm:$0xff]  ;;  %v230_v24 = vld [vmem:[%s623_s20 + $0x1c0] sm:$0xff] }
  0x2c   : > { %461 = vst [vmem:[%s651_s25 + $0xb8] sm:$0xff] %v397_v55  ;;  %v408_v37 = vmax.f32 %v344_v22, 0.0  ;;  %v348_v38 = vadd.f32 %v628_v1, %v280_v23  ;;  %v284_v39 = vmul.f32 %v618_v0, %v216_v28  ;;  %v409_v41 = vmax.f32 %v345_v26, 0.0 }
  0x2d   : > { %462 = vst [vmem:[%s651_s25 + $0xc0] sm:$0xff] %v398_v59  ;;  %v349_v42 = vadd.f32 %v628_v1, %v281_v27  ;;  %v285_v43 = vmul.f32 %v618_v0, %v217_v32  ;;  %v410_v45 = vmax.f32 %v346_v30, 0.0  ;;  %v350_v46 = vadd.f32 %v628_v1, %v282_v31 }
  0x2e   : > { %463 = vst [vmem:[%s651_s25 + $0xc8] sm:$0xff] %v399_v63  ;;  %v286_v47 = vmul.f32 %v618_v0, %v218_v36  ;;  %v411_v49 = vmax.f32 %v347_v34, 0.0  ;;  %v351_v50 = vadd.f32 %v628_v1, %v283_v35  ;;  %v287_v51 = vmul.f32 %v618_v0, %v219_v40 }
  0x2f   : > { %464 = vst [vmem:[%s651_s25 + $0xd0] sm:$0xff] %v400_v5  ;;  %v412_v53 = vmax.f32 %v348_v38, 0.0  ;;  %v352_v54 = vadd.f32 %v628_v1, %v284_v39  ;;  %v288_v55 = vmul.f32 %v618_v0, %v220_v44  ;;  %v413_v57 = vmax.f32 %v349_v42, 0.0 }
  0x30   : > { %465 = vst [vmem:[%s651_s25 + $0xd8] sm:$0xff] %v401_v9  ;;  %v353_v58 = vadd.f32 %v628_v1, %v285_v43  ;;  %v289_v59 = vmul.f32 %v618_v0, %v221_v48  ;;  %v414_v61 = vmax.f32 %v350_v46, 0.0  ;;  %v354_v62 = vadd.f32 %v628_v1, %v286_v47 }
  0x31   : > { %466 = vst [vmem:[%s651_s25 + $0xe0] sm:$0xff] %v402_v13  ;;  %v290_v63 = vmul.f32 %v618_v0, %v222_v52  ;;  %v415_v4 = vmax.f32 %v351_v50, 0.0  ;;  %v355_v5 = vadd.f32 %v628_v1, %v287_v51  ;;  %v291_v6 = vmul.f32 %v618_v0, %v223_v56 }
  0x32   : > { %467 = vst [vmem:[%s651_s25 + $0xe8] sm:$0xff] %v403_v17  ;;  %v416_v8 = vmax.f32 %v352_v54, 0.0  ;;  %v356_v9 = vadd.f32 %v628_v1, %v288_v55  ;;  %v292_v10 = vmul.f32 %v618_v0, %v224_v60  ;;  %v417_v12 = vmax.f32 %v353_v58, 0.0 }
  0x33   : > { %468 = vst [vmem:[%s651_s25 + $0xf0] sm:$0xff] %v404_v21  ;;  %v357_v13 = vadd.f32 %v628_v1, %v289_v59  ;;  %v293_v14 = vmul.f32 %v618_v0, %v225_v2  ;;  %v305_v16 = vmul.f32 %v618_v0, %v237_v3  ;;  %v418_v17 = vmax.f32 %v354_v62, 0.0 }
  0x34   : > { %469 = vst [vmem:[%s651_s25 + $0xf8] sm:$0xff] %v405_v25  ;;  %v358_v18 = vadd.f32 %v628_v1, %v290_v63  ;;  %v294_v19 = vmul.f32 %v618_v0, %v226_v7  ;;  %v419_v21 = vmax.f32 %v355_v5, 0.0  ;;  %v359_v22 = vadd.f32 %v628_v1, %v291_v6 }
  0x35   : > { %470 = vst [vmem:[%s651_s25 + $0x100] sm:$0xff] %v406_v29  ;;  %v295_v23 = vmul.f32 %v618_v0, %v227_v11  ;;  %v841_v25 = vadd.f32 %v628_v1, %v305_v16  ;;  %v420_v26 = vmax.f32 %v356_v9, 0.0  ;;  %v360_v27 = vadd.f32 %v628_v1, %v292_v10  ;;  %v231_v29 = vld [vmem:[%s623_s20 + $0x1c8] sm:$0xff] }
  0x36   : > { %471 = vst [vmem:[%s651_s25 + $0x108] sm:$0xff] %v407_v33  ;;  %v296_v28 = vmul.f32 %v618_v0, %v228_v15  ;;  %v421_v30 = vmax.f32 %v357_v13, 0.0  ;;  %v361_v31 = vadd.f32 %v628_v1, %v293_v14  ;;  %v297_v32 = vmul.f32 %v618_v0, %v229_v20  ;;  %v232_v33 = vld [vmem:[%s623_s20 + $0x1d0] sm:$0xff] }
  0x37   : > { %472 = vst [vmem:[%s651_s25 + $0x110] sm:$0xff] %v408_v37  ;;  %v422_v34 = vmax.f32 %v358_v18, 0.0  ;;  %v362_v35 = vadd.f32 %v628_v1, %v294_v19  ;;  %v298_v36 = vmul.f32 %v618_v0, %v230_v24  ;;  %v233_v37 = vld [vmem:[%s623_s20 + $0x1d8] sm:$0xff]  ;;  %v423_v38 = vmax.f32 %v359_v22, 0.0 }
  0x38   : > { %473 = vst [vmem:[%s651_s25 + $0x118] sm:$0xff] %v409_v41  ;;  %v363_v39 = vadd.f32 %v628_v1, %v295_v23  ;;  %v299_v40 = vmul.f32 %v618_v0, %v231_v29  ;;  %v234_v41 = vld [vmem:[%s623_s20 + $0x1e0] sm:$0xff]  ;;  %v424_v42 = vmax.f32 %v360_v27, 0.0  ;;  %v364_v43 = vadd.f32 %v628_v1, %v296_v28 }
  0x39   : > { %474 = vst [vmem:[%s651_s25 + $0x120] sm:$0xff] %v410_v45  ;;  %v300_v44 = vmul.f32 %v618_v0, %v232_v33  ;;  %v235_v45 = vld [vmem:[%s623_s20 + $0x1e8] sm:$0xff]  ;;  %v425_v46 = vmax.f32 %v361_v31, 0.0  ;;  %v365_v47 = vadd.f32 %v628_v1, %v297_v32  ;;  %v301_v48 = vmul.f32 %v618_v0, %v233_v37 }
  0x3a   : > { %475 = vst [vmem:[%s651_s25 + $0x128] sm:$0xff] %v411_v49  ;;  %v236_v49 = vld [vmem:[%s623_s20 + $0x1f0] sm:$0xff]  ;;  %v426_v50 = vmax.f32 %v362_v35, 0.0  ;;  %v366_v51 = vadd.f32 %v628_v1, %v298_v36  ;;  %v302_v52 = vmul.f32 %v618_v0, %v234_v41  ;;  %v367_v54 = vadd.f32 %v628_v1, %v299_v40 }
  0x3b   : > { %476 = vst [vmem:[%s651_s25 + $0x130] sm:$0xff] %v412_v53  ;;  %v427_v53 = vmax.f32 %v363_v39, 0.0  ;;  %v303_v55 = vmul.f32 %v618_v0, %v235_v45  ;;  %v428_v56 = vmax.f32 %v364_v43, 0.0  ;;  %v304_v58 = vmul.f32 %v618_v0, %v236_v49 }
  0x3c   : > { %477 = vst [vmem:[%s651_s25 + $0x138] sm:$0xff] %v413_v57  ;;  %v368_v57 = vadd.f32 %v628_v1, %v300_v44  ;;  %v429_v59 = vmax.f32 %v365_v47, 0.0  ;;  %v369_v60 = vadd.f32 %v628_v1, %v301_v48  ;;  %v370_v62 = vadd.f32 %v628_v1, %v302_v52 }
  0x3d   : > { %478 = vst [vmem:[%s651_s25 + $0x140] sm:$0xff] %v414_v61  ;;  %v430_v61 = vmax.f32 %v366_v51, 0.0  ;;  %v431_v63 = vmax.f32 %v367_v54, 0.0  ;;  %v371_v2 = vadd.f32 %v628_v1, %v303_v55  ;;  %v372_v3 = vadd.f32 %v628_v1, %v304_v58 }
  0x3e   : > { %479 = vst [vmem:[%s651_s25 + $0x148] sm:$0xff] %v415_v4  ;;  %v432_v0 = vmax.f32 %v368_v57, 0.0  ;;  %v433_v4 = vmax.f32 %v369_v60, 0.0  ;;  %v434_v5 = vmax.f32 %v370_v62, 0.0 }
  0x3f   : > { %480 = vst [vmem:[%s651_s25 + $0x150] sm:$0xff] %v416_v8  ;;  %v435_v6 = vmax.f32 %v371_v2, 0.0  ;;  %v436_v7 = vmax.f32 %v372_v3, 0.0  ;;  %v437_v8 = vmax.f32 %v841_v25, 0.0 }
  0x40   : > { %481 = vst [vmem:[%s651_s25 + $0x158] sm:$0xff] %v417_v12 }
  0x41   : > { %482 = vst [vmem:[%s651_s25 + $0x160] sm:$0xff] %v418_v17 }
  0x42   : > { %483 = vst [vmem:[%s651_s25 + $0x168] sm:$0xff] %v419_v21 }
  0x43   : > { %484 = vst [vmem:[%s651_s25 + $0x170] sm:$0xff] %v420_v26 }
  0x44   : > { %485 = vst [vmem:[%s651_s25 + $0x178] sm:$0xff] %v421_v30 }
  0x45   : > { %486 = vst [vmem:[%s651_s25 + $0x180] sm:$0xff] %v422_v34 }
  0x46   : > { %487 = vst [vmem:[%s651_s25 + $0x188] sm:$0xff] %v423_v38 }
  0x47   : > { %488 = vst [vmem:[%s651_s25 + $0x190] sm:$0xff] %v424_v42 }
  0x48   : > { %489 = vst [vmem:[%s651_s25 + $0x198] sm:$0xff] %v425_v46 }
  0x49   : > { %490 = vst [vmem:[%s651_s25 + $0x1a0] sm:$0xff] %v426_v50 }
  0x4a   : > { %491 = vst [vmem:[%s651_s25 + $0x1a8] sm:$0xff] %v427_v53 }
  0x4b   : > { %492 = vst [vmem:[%s651_s25 + $0x1b0] sm:$0xff] %v428_v56 }
  0x4c   : > { %493 = vst [vmem:[%s651_s25 + $0x1b8] sm:$0xff] %v429_v59 }
  0x4d   : > { %494 = vst [vmem:[%s651_s25 + $0x1c0] sm:$0xff] %v430_v61 }
  0x4e   : > { %495 = vst [vmem:[%s651_s25 + $0x1c8] sm:$0xff] %v431_v63 }
  0x4f   : > { %496 = vst [vmem:[%s651_s25 + $0x1d0] sm:$0xff] %v432_v0 }
  0x50   : > { %497 = vst [vmem:[%s651_s25 + $0x1d8] sm:$0xff] %v433_v4 }
  0x51   : > { %498 = vst [vmem:[%s651_s25 + $0x1e0] sm:$0xff] %v434_v5 }
  0x52   : > { %499 = vst [vmem:[%s651_s25 + $0x1e8] sm:$0xff] %v435_v6 }
  0x53   : > { %500 = vst [vmem:[%s651_s25 + $0x1f0] sm:$0xff] %v436_v7 }
  0x54   : > { %501 = vst [vmem:[%s651_s25 + $0x1f8] sm:$0xff] %v437_v8 }
  0x55 PF: > { %s13_s12 = sadd.s32 1, %s585_s12  }
  0x56   : > { %p10_p4 = scmp.ge.s32.totalorder %s13_s12, 4  }
  0x58   :  { %12 = sbr.rel (!%p10_p4) target bundleno = 1 (0x1), region = 62 }

// kernel: cnn3d_layer.2
= control target key start
LH: loop header
LB: loop body
LE: loop exit
PB: predicated region body
PF: predicated region fallthrough
CT: control target
= control target key end

     0   :  { %s1347_s18 = smov 0   ;;  %s1961_s0 = inlined_call_operand.vmem [shape: bf16[1024,128], index: 0, kind: input, shape index: {}]   ;;  %s1962_s1 = inlined_call_operand.vmem [shape: bf16[128,128], index: 1, kind: input, shape index: {}]   ;;  %s1963_s2 = inlined_call_operand.vmem [shape: f32[1,128], index: 2, kind: input, shape index: {}]   ;;  %s1964_s3 = inlined_call_operand.vmem [shape: f32[1024,128], index: 3, kind: output, shape index: {0}]   ;;  %s1965_s4 = inlined_call_operand.vmem [shape: f32[1,128], index: 4, kind: output, shape index: {1}]   ;;  %s1966_s5 = inlined_call_operand.vmem [shape: f32[1,128], index: 5, kind: output, shape index: {2}]  }
   0x1 LB: > { %s1062_s19 = sadd.s32 4294967295, %s1314_s18   ;;  %p1066_p0 = scmp.ge.s32.totalorder %s1314_s18, 1  ;;  %s1314_s18 = sphi %s1347_s18, %s16_s18  }
   0x2   : > { %p183_p1 = scmp.lt.s32.totalorder %s1314_s18, 3 }
   0x4   : > { %p184_p2 = pnand %p1066_p0, %p183_p1 }
   0x6   : > { %187 = sbr.rel (%p184_p2) target bundleno = 447 (0x1bf), region = 32 }
   0xb   : > { %v1273_v0 = vld [vmem:[%s1962_s1 + $0x38] sm:$0xff]  ;;  %v1272_v1 = vld [vmem:[%s1962_s1 + $0x30] sm:$0xff]  ;;  %v1271_v2 = vld [vmem:[%s1962_s1 + $0x28] sm:$0xff]  ;;  %s1067_s28 = sshll.u32 %s1062_s19, 6  ;;  %p1231_p4 = scmp.ne.s32.totalorder %s1062_s19, 0 }
   0xc   : > { %547 = vmatpush.bf16.msra.mxu0 %v1273_v0  ;;  %1274 = vmatpush.bf16.msra.mxu1 %v1273_v0  ;;  %v1270_v3 = vld [vmem:[%s1962_s1 + $0x20] sm:$0xff]  ;;  %v1269_v4 = vld [vmem:[%s1962_s1 + $0x18] sm:$0xff]  ;;  %p212_p3 = scmp.lt.s32.totalorder %s1067_s28, 127  ;;  %v1268_v5 = vld [vmem:[%s1962_s1 + $0x10] sm:$0xff] }
   0xd   : > { %1275 = vmatpush.bf16.msra.mxu2 %v1273_v0  ;;  %1276 = vmatpush.bf16.msra.mxu3 %v1273_v0  ;;  %v1267_v6 = vld [vmem:[%s1962_s1 + $0x8] sm:$0xff]  ;;  %v1266_v7 = vld [vmem:[%s1962_s1] sm:$0xff] }
   0xe   : > { %s2016_s28 = smov (!%p212_p3, %s1067_s28), 127  ;;  %v1425_v40 = vld [vmem:[%s1963_s2] ss:$0 sm:$0xff] }
   0xf   : > { %s1068_s10 = sshll.u32 %s2016_s28, 2  ;;  %s1070_s16 = sshll.u32 %s2016_s28, 3 }
  0x10   : > { %548 = vmatpush.bf16.msra.mxu0 %v1272_v1  ;;  %1277 = vmatpush.bf16.msra.mxu1 %v1272_v1  ;;  %s1387_s15 = scalar_lea.vmem %s1961_s0, %s1068_s10  ;;  %s1430_s23 = scalar_lea.vmem %s1964_s3, %s1070_s16 }
  0x11   : > { %1278 = vmatpush.bf16.msra.mxu2 %v1272_v1  ;;  %1279 = vmatpush.bf16.msra.mxu3 %v1272_v1  ;;  %v1234_v8 = vld [vmem:[%s1387_s15] sm:$0xff]  ;;  %v1235_v12 = vld [vmem:[%s1387_s15 + $0x8] sm:$0xff]  ;;  %v1236_v16 = vld [vmem:[%s1387_s15 + $0x10] sm:$0xff] }
  0x12   : > { %v1242_v9 = vld [vmem:[%s1387_s15 + $0x40] sm:$0xff]  ;;  %v1243_v13 = vld [vmem:[%s1387_s15 + $0x48] sm:$0xff]  ;;  %v1244_v17 = vld [vmem:[%s1387_s15 + $0x50] sm:$0xff] }
  0x13   : > { %v1250_v10 = vld [vmem:[%s1387_s15 + $0x80] sm:$0xff]  ;;  %v1251_v14 = vld [vmem:[%s1387_s15 + $0x88] sm:$0xff]  ;;  %v1252_v18 = vld [vmem:[%s1387_s15 + $0x90] sm:$0xff] }
  0x14   : > { %549 = vmatpush.bf16.msra.mxu0 %v1271_v2  ;;  %1280 = vmatpush.bf16.msra.mxu1 %v1271_v2  ;;  %v1258_v11 = vld [vmem:[%s1387_s15 + $0xc0] sm:$0xff]  ;;  %v1259_v15 = vld [vmem:[%s1387_s15 + $0xc8] sm:$0xff]  ;;  %v1260_v19 = vld [vmem:[%s1387_s15 + $0xd0] sm:$0xff] }
  0x15   : > { %1281 = vmatpush.bf16.msra.mxu2 %v1271_v2  ;;  %1282 = vmatpush.bf16.msra.mxu3 %v1271_v2  ;;  %v1237_v20 = vld [vmem:[%s1387_s15 + $0x18] sm:$0xff]  ;;  %v1238_v24 = vld [vmem:[%s1387_s15 + $0x20] sm:$0xff]  ;;  %v1239_v28 = vld [vmem:[%s1387_s15 + $0x28] sm:$0xff] }
  0x16   : > { %v1245_v21 = vld [vmem:[%s1387_s15 + $0x58] sm:$0xff]  ;;  %v1246_v25 = vld [vmem:[%s1387_s15 + $0x60] sm:$0xff]  ;;  %v1247_v29 = vld [vmem:[%s1387_s15 + $0x68] sm:$0xff] }
  0x17   : > { %v1253_v22 = vld [vmem:[%s1387_s15 + $0x98] sm:$0xff]  ;;  %v1254_v26 = vld [vmem:[%s1387_s15 + $0xa0] sm:$0xff]  ;;  %v1255_v30 = vld [vmem:[%s1387_s15 + $0xa8] sm:$0xff] }
  0x18   : > { %550 = vmatpush.bf16.msra.mxu0 %v1270_v3  ;;  %1283 = vmatpush.bf16.msra.mxu1 %v1270_v3  ;;  %v1261_v23 = vld [vmem:[%s1387_s15 + $0xd8] sm:$0xff]  ;;  %v1262_v27 = vld [vmem:[%s1387_s15 + $0xe0] sm:$0xff]  ;;  %v1263_v31 = vld [vmem:[%s1387_s15 + $0xe8] sm:$0xff] }
  0x19   : > { %1284 = vmatpush.bf16.msra.mxu2 %v1270_v3  ;;  %1285 = vmatpush.bf16.msra.mxu3 %v1270_v3  ;;  %v1240_v32 = vld [vmem:[%s1387_s15 + $0x30] sm:$0xff]  ;;  %v1241_v36 = vld [vmem:[%s1387_s15 + $0x38] sm:$0xff] }
  0x1a   : > { %v1248_v33 = vld [vmem:[%s1387_s15 + $0x70] sm:$0xff]  ;;  %v1249_v37 = vld [vmem:[%s1387_s15 + $0x78] sm:$0xff] }
  0x1b   : > { %v1256_v34 = vld [vmem:[%s1387_s15 + $0xb0] sm:$0xff]  ;;  %v1257_v38 = vld [vmem:[%s1387_s15 + $0xb8] sm:$0xff] }
  0x1c   : > { %551 = vmatpush.bf16.msra.mxu0 %v1269_v4  ;;  %1286 = vmatpush.bf16.msra.mxu1 %v1269_v4  ;;  %v1264_v35 = vld [vmem:[%s1387_s15 + $0xf0] sm:$0xff]  ;;  %v1265_v39 = vld [vmem:[%s1387_s15 + $0xf8] sm:$0xff] }
  0x1d   : > { %1287 = vmatpush.bf16.msra.mxu2 %v1269_v4  ;;  %1288 = vmatpush.bf16.msra.mxu3 %v1269_v4 }
  0x20   : > { %552 = vmatpush.bf16.msra.mxu0 %v1268_v5  ;;  %1289 = vmatpush.bf16.msra.mxu1 %v1268_v5 }
  0x21   : > { %1290 = vmatpush.bf16.msra.mxu2 %v1268_v5  ;;  %1291 = vmatpush.bf16.msra.mxu3 %v1268_v5 }
  0x24   : > { %553 = vmatpush.bf16.msra.mxu0 %v1267_v6  ;;  %1292 = vmatpush.bf16.msra.mxu1 %v1267_v6 }
  0x25   : > { %1293 = vmatpush.bf16.msra.mxu2 %v1267_v6  ;;  %1294 = vmatpush.bf16.msra.mxu3 %v1267_v6 }
  0x28   : > { %554 = vmatpush.bf16.msra.mxu0 %v1266_v7  ;;  %1295 = vmatpush.bf16.msra.mxu1 %v1266_v7 }
  0x29   : > { %1296 = vmatpush.bf16.msra.mxu2 %v1266_v7  ;;  %1297 = vmatpush.bf16.msra.mxu3 %v1266_v7 }
  0x2b   : > { %555 = vmatmul.bf16.vlgmr.msra.gmra.mxu0 %v1234_v8  ;;  %595 = vmatmul.bf16.vlgmr.msra.gmra.mxu1 %v1242_v9 }
  0x2c   : > { %635 = vmatmul.bf16.vlgmr.msra.gmra.mxu2 %v1250_v10  ;;  %675 = vmatmul.bf16.vlgmr.msra.gmra.mxu3 %v1258_v11 }
  0x3b   : > { %560 = vmatmul.bf16.gmra.mxu0 %v1235_v12  ;;  %600 = vmatmul.bf16.gmra.mxu1 %v1243_v13 }
  0x3c   : > { %640 = vmatmul.bf16.gmra.mxu2 %v1251_v14  ;;  %680 = vmatmul.bf16.gmra.mxu3 %v1259_v15 }
  0x4b   : > { %565 = vmatmul.bf16.gmra.mxu0 %v1236_v16  ;;  %605 = vmatmul.bf16.gmra.mxu1 %v1244_v17 }
  0x4c   : > { %645 = vmatmul.bf16.gmra.mxu2 %v1252_v18  ;;  %685 = vmatmul.bf16.gmra.mxu3 %v1260_v19 }
  0x5b   : > { %570 = vmatmul.bf16.gmra.mxu0 %v1237_v20  ;;  %610 = vmatmul.bf16.gmra.mxu1 %v1245_v21 }
  0x5c   : > { %650 = vmatmul.bf16.gmra.mxu2 %v1253_v22  ;;  %690 = vmatmul.bf16.gmra.mxu3 %v1261_v23 }
  0x6b   : > { %575 = vmatmul.bf16.gmra.mxu0 %v1238_v24  ;;  %615 = vmatmul.bf16.gmra.mxu1 %v1246_v25 }
  0x6c   : > { %655 = vmatmul.bf16.gmra.mxu2 %v1254_v26  ;;  %695 = vmatmul.bf16.gmra.mxu3 %v1262_v27 }
  0x7b   : > { %580 = vmatmul.bf16.gmra.mxu0 %v1239_v28  ;;  %620 = vmatmul.bf16.gmra.mxu1 %v1247_v29 }
  0x7c   : > { %660 = vmatmul.bf16.gmra.mxu2 %v1255_v30  ;;  %700 = vmatmul.bf16.gmra.mxu3 %v1263_v31 }
  0x8b   : > { %585 = vmatmul.bf16.gmra.mxu0 %v1240_v32  ;;  %625 = vmatmul.bf16.gmra.mxu1 %v1248_v33 }
  0x8c   : > { %665 = vmatmul.bf16.gmra.mxu2 %v1256_v34  ;;  %705 = vmatmul.bf16.gmra.mxu3 %v1264_v35 }
  0x9b   : > { %590 = vmatmul.bf16.gmra.mxu0 %v1241_v36  ;;  %630 = vmatmul.bf16.gmra.mxu1 %v1249_v37 }
  0x9c   : > { %670 = vmatmul.bf16.gmra.mxu2 %v1257_v38  ;;  %710 = vmatmul.bf16.gmra.mxu3 %v1265_v39 }
  0xa8   : > { %v556_v41 = vpop.f32.mrf.mxu0  ;;  %v596_v42 = vpop.f32.mrf.mxu1 }
  0xa9   : > { %v1433_v43 = vadd.f32 %v1425_v40, %v556_v41  ;;  %v1436_v44 = vadd.f32 %v1425_v40, %v596_v42 }
  0xab   : > { %716 = vst [vmem:[%s1430_s23] sm:$0xff] %v1433_v43 }
  0xac   : > { %732 = vst [vmem:[%s1430_s23 + $0x80] sm:$0xff] %v1436_v44 }
  0xaf   : > { %v636_v45 = vpop.f32.mrf.mxu2  ;;  %v676_v46 = vpop.f32.mrf.mxu3 }
  0xb0   : > { %v1443_v47 = vadd.f32 %v1425_v40, %v636_v45  ;;  %v1446_v48 = vadd.f32 %v1425_v40, %v676_v46  ;;  %v558_v49 = vpop.f32.mrf.mxu0  ;;  %v598_v50 = vpop.f32.mrf.mxu1 }
  0xb1   : > { %v1449_v51 = vadd.f32 %v1425_v40, %v558_v49  ;;  %v1452_v52 = vadd.f32 %v1425_v40, %v598_v50 }
  0xb2   : > { %748 = vst [vmem:[%s1430_s23 + $0x100] sm:$0xff] %v1443_v47 }
  0xb3   : > { %764 = vst [vmem:[%s1430_s23 + $0x180] sm:$0xff] %v1446_v48 }
  0xb4   : > { %717 = vst [vmem:[%s1430_s23 + $0x8] sm:$0xff] %v1449_v51 }
  0xb5   : > { %733 = vst [vmem:[%s1430_s23 + $0x88] sm:$0xff] %v1452_v52 }
  0xb7   : > { %v638_v53 = vpop.f32.mrf.mxu2  ;;  %v678_v54 = vpop.f32.mrf.mxu3 }
  0xb8   : > { %v1463_v55 = vadd.f32 %v1425_v40, %v638_v53  ;;  %v1466_v56 = vadd.f32 %v1425_v40, %v678_v54  ;;  %v561_v57 = vpop.f32.mrf.mxu0  ;;  %v601_v58 = vpop.f32.mrf.mxu1 }
  0xb9   : > { %v1469_v59 = vadd.f32 %v1425_v40, %v561_v57  ;;  %v1472_v60 = vadd.f32 %v1425_v40, %v601_v58 }
  0xba   : > { %749 = vst [vmem:[%s1430_s23 + $0x108] sm:$0xff] %v1463_v55 }
  0xbb   : > { %765 = vst [vmem:[%s1430_s23 + $0x188] sm:$0xff] %v1466_v56 }
  0xbc   : > { %718 = vst [vmem:[%s1430_s23 + $0x10] sm:$0xff] %v1469_v59 }
  0xbd   : > { %734 = vst [vmem:[%s1430_s23 + $0x90] sm:$0xff] %v1472_v60 }
  0xbf   : > { %v641_v61 = vpop.f32.mrf.mxu2  ;;  %v681_v62 = vpop.f32.mrf.mxu3 }
  0xc0   : > { %v1483_v63 = vadd.f32 %v1425_v40, %v641_v61  ;;  %v1486_v0 = vadd.f32 %v1425_v40, %v681_v62  ;;  %v563_v1 = vpop.f32.mrf.mxu0  ;;  %v603_v2 = vpop.f32.mrf.mxu1 }
  0xc1   : > { %v1489_v3 = vadd.f32 %v1425_v40, %v563_v1  ;;  %v1492_v4 = vadd.f32 %v1425_v40, %v603_v2 }
  0xc2   : > { %750 = vst [vmem:[%s1430_s23 + $0x110] sm:$0xff] %v1483_v63 }
  0xc3   : > { %766 = vst [vmem:[%s1430_s23 + $0x190] sm:$0xff] %v1486_v0 }
  0xc4   : > { %719 = vst [vmem:[%s1430_s23 + $0x18] sm:$0xff] %v1489_v3 }
  0xc5   : > { %735 = vst [vmem:[%s1430_s23 + $0x98] sm:$0xff] %v1492_v4 }
  0xc7   : > { %v643_v5 = vpop.f32.mrf.mxu2  ;;  %v683_v6 = vpop.f32.mrf.mxu3 }
  0xc8   : > { %v1503_v7 = vadd.f32 %v1425_v40, %v643_v5  ;;  %v1506_v8 = vadd.f32 %v1425_v40, %v683_v6  ;;  %v566_v9 = vpop.f32.mrf.mxu0  ;;  %v606_v10 = vpop.f32.mrf.mxu1 }
  0xc9   : > { %v1509_v11 = vadd.f32 %v1425_v40, %v566_v9  ;;  %v1512_v12 = vadd.f32 %v1425_v40, %v606_v10 }
  0xca   : > { %751 = vst [vmem:[%s1430_s23 + $0x118] sm:$0xff] %v1503_v7 }
  0xcb   : > { %767 = vst [vmem:[%s1430_s23 + $0x198] sm:$0xff] %v1506_v8 }
  0xcc   : > { %720 = vst [vmem:[%s1430_s23 + $0x20] sm:$0xff] %v1509_v11 }
  0xcd   : > { %736 = vst [vmem:[%s1430_s23 + $0xa0] sm:$0xff] %v1512_v12 }
  0xcf   : > { %v646_v13 = vpop.f32.mrf.mxu2  ;;  %v686_v14 = vpop.f32.mrf.mxu3 }
  0xd0   : > { %v1523_v15 = vadd.f32 %v1425_v40, %v646_v13  ;;  %v1526_v16 = vadd.f32 %v1425_v40, %v686_v14  ;;  %v568_v17 = vpop.f32.mrf.mxu0  ;;  %v608_v18 = vpop.f32.mrf.mxu1 }
  0xd1   : > { %v1529_v19 = vadd.f32 %v1425_v40, %v568_v17  ;;  %v1532_v20 = vadd.f32 %v1425_v40, %v608_v18 }
  0xd2   : > { %1991 = vst [vmem:[#allocation2_spill] sm:$0xff] %v1526_v16 }
  0xd3   : > { %752 = vst [vmem:[%s1430_s23 + $0x120] sm:$0xff] %v1523_v15 }
  0xd4   : > { %768 = vst [vmem:[%s1430_s23 + $0x1a0] sm:$0xff] %v1526_v16 }
  0xd5   : > { %721 = vst [vmem:[%s1430_s23 + $0x28] sm:$0xff] %v1529_v19 }
  0xd6   : > { %737 = vst [vmem:[%s1430_s23 + $0xa8] sm:$0xff] %v1532_v20 }
  0xd7   : > { %v648_v21 = vpop.f32.mrf.mxu2  ;;  %v688_v22 = vpop.f32.mrf.mxu3 }
  0xd8   : > { %v1543_v23 = vadd.f32 %v1425_v40, %v648_v21  ;;  %v1546_v24 = vadd.f32 %v1425_v40, %v688_v22  ;;  %v571_v25 = vpop.f32.mrf.mxu0  ;;  %v611_v26 = vpop.f32.mrf.mxu1 }
  0xd9   : > { %v1549_v27 = vadd.f32 %v1425_v40, %v571_v25  ;;  %v1552_v28 = vadd.f32 %v1425_v40, %v611_v26 }
  0xda   : > { %1992 = vst [vmem:[#allocation3_spill] sm:$0xff] %v1546_v24 }
  0xdb   : > { %753 = vst [vmem:[%s1430_s23 + $0x128] sm:$0xff] %v1543_v23 }
  0xdc   : > { %769 = vst [vmem:[%s1430_s23 + $0x1a8] sm:$0xff] %v1546_v24 }
  0xdd   : > { %722 = vst [vmem:[%s1430_s23 + $0x30] sm:$0xff] %v1549_v27 }
  0xde   : > { %738 = vst [vmem:[%s1430_s23 + $0xb0] sm:$0xff] %v1552_v28 }
  0xdf   : > { %v651_v29 = vpop.f32.mrf.mxu2  ;;  %v691_v30 = vpop.f32.mrf.mxu3 }
  0xe0   : > { %v1563_v31 = vadd.f32 %v1425_v40, %v651_v29  ;;  %v1566_v32 = vadd.f32 %v1425_v40, %v691_v30  ;;  %v573_v33 = vpop.f32.mrf.mxu0  ;;  %v613_v34 = vpop.f32.mrf.mxu1 }
  0xe1   : > { %v1569_v35 = vadd.f32 %v1425_v40, %v573_v33  ;;  %v1572_v36 = vadd.f32 %v1425_v40, %v613_v34 }
  0xe2   : > { %1993 = vst [vmem:[#allocation4_spill] sm:$0xff] %v1566_v32 }
  0xe3   : > { %754 = vst [vmem:[%s1430_s23 + $0x130] sm:$0xff] %v1563_v31 }
  0xe4   : > { %770 = vst [vmem:[%s1430_s23 + $0x1b0] sm:$0xff] %v1566_v32 }
  0xe5   : > { %723 = vst [vmem:[%s1430_s23 + $0x38] sm:$0xff] %v1569_v35 }
  0xe6   : > { %739 = vst [vmem:[%s1430_s23 + $0xb8] sm:$0xff] %v1572_v36 }
  0xe7   : > { %v653_v37 = vpop.f32.mrf.mxu2  ;;  %v693_v38 = vpop.f32.mrf.mxu3 }
  0xe8   : > { %v1583_v39 = vadd.f32 %v1425_v40, %v653_v37  ;;  %v1586_v41 = vadd.f32 %v1425_v40, %v693_v38  ;;  %v576_v42 = vpop.f32.mrf.mxu0  ;;  %v616_v45 = vpop.f32.mrf.mxu1 }
  0xe9   : > { %v1589_v46 = vadd.f32 %v1425_v40, %v576_v42  ;;  %v1592_v49 = vadd.f32 %v1425_v40, %v616_v45 }
  0xea   : > { %1994 = vst [vmem:[#allocation5_spill] sm:$0xff] %v1586_v41 }
  0xeb   : > { %755 = vst [vmem:[%s1430_s23 + $0x138] sm:$0xff] %v1583_v39 }
  0xec   : > { %771 = vst [vmem:[%s1430_s23 + $0x1b8] sm:$0xff] %v1586_v41 }
  0xed   : > { %724 = vst [vmem:[%s1430_s23 + $0x40] sm:$0xff] %v1589_v46 }
  0xee   : > { %740 = vst [vmem:[%s1430_s23 + $0xc0] sm:$0xff] %v1592_v49 }
  0xef   : > { %v656_v50 = vpop.f32.mrf.mxu2  ;;  %v696_v53 = vpop.f32.mrf.mxu3 }
  0xf0   : > { %v1603_v54 = vadd.f32 %v1425_v40, %v656_v50  ;;  %v1606_v57 = vadd.f32 %v1425_v40, %v696_v53  ;;  %v578_v58 = vpop.f32.mrf.mxu0  ;;  %v618_v61 = vpop.f32.mrf.mxu1 }
  0xf1   : > { %v1609_v62 = vadd.f32 %v1425_v40, %v578_v58  ;;  %v1612_v1 = vadd.f32 %v1425_v40, %v618_v61 }
  0xf2   : > { %1995 = vst [vmem:[#allocation6_spill] sm:$0xff] %v1606_v57 }
  0xf3   : > { %756 = vst [vmem:[%s1430_s23 + $0x140] sm:$0xff] %v1603_v54 }
  0xf4   : > { %772 = vst [vmem:[%s1430_s23 + $0x1c0] sm:$0xff] %v1606_v57 }
  0xf5   : > { %725 = vst [vmem:[%s1430_s23 + $0x48] sm:$0xff] %v1609_v62 }
  0xf6   : > { %741 = vst [vmem:[%s1430_s23 + $0xc8] sm:$0xff] %v1612_v1 }
  0xf7   : > { %v658_v2 = vpop.f32.mrf.mxu2  ;;  %v698_v5 = vpop.f32.mrf.mxu3 }
  0xf8   : > { %v1623_v6 = vadd.f32 %v1425_v40, %v658_v2  ;;  %v1626_v9 = vadd.f32 %v1425_v40, %v698_v5  ;;  %v581_v10 = vpop.f32.mrf.mxu0  ;;  %v621_v13 = vpop.f32.mrf.mxu1 }
  0xf9   : > { %v1629_v14 = vadd.f32 %v1425_v40, %v581_v10  ;;  %v1632_v17 = vadd.f32 %v1425_v40, %v621_v13 }
  0xfa   : > { %1996 = vst [vmem:[#allocation7_spill] sm:$0xff] %v1626_v9 }
  0xfb   : > { %757 = vst [vmem:[%s1430_s23 + $0x148] sm:$0xff] %v1623_v6 }
  0xfc   : > { %773 = vst [vmem:[%s1430_s23 + $0x1c8] sm:$0xff] %v1626_v9 }
  0xfd   : > { %726 = vst [vmem:[%s1430_s23 + $0x50] sm:$0xff] %v1629_v14 }
  0xfe   : > { %742 = vst [vmem:[%s1430_s23 + $0xd0] sm:$0xff] %v1632_v17 }
  0xff   : > { %v661_v18 = vpop.f32.mrf.mxu2  ;;  %v701_v21 = vpop.f32.mrf.mxu3 }
 0x100   : > { %v1643_v22 = vadd.f32 %v1425_v40, %v661_v18  ;;  %v1646_v25 = vadd.f32 %v1425_v40, %v701_v21  ;;  %v583_v26 = vpop.f32.mrf.mxu0  ;;  %v623_v29 = vpop.f32.mrf.mxu1 }
 0x101   : > { %v1649_v30 = vadd.f32 %v1425_v40, %v583_v26  ;;  %v1652_v33 = vadd.f32 %v1425_v40, %v623_v29 }
 0x102   : > { %1997 = vst [vmem:[#allocation8_spill] sm:$0xff] %v1646_v25 }
 0x103   : > { %758 = vst [vmem:[%s1430_s23 + $0x150] sm:$0xff] %v1643_v22 }
 0x104   : > { %774 = vst [vmem:[%s1430_s23 + $0x1d0] sm:$0xff] %v1646_v25 }
 0x105   : > { %727 = vst [vmem:[%s1430_s23 + $0x58] sm:$0xff] %v1649_v30 }
 0x106   : > { %743 = vst [vmem:[%s1430_s23 + $0xd8] sm:$0xff] %v1652_v33 }
 0x107   : > { %v663_v34 = vpop.f32.mrf.mxu2  ;;  %v703_v37 = vpop.f32.mrf.mxu3 }
 0x108   : > { %v1663_v38 = vadd.f32 %v1425_v40, %v663_v34  ;;  %v1666_v42 = vadd.f32 %v1425_v40, %v703_v37  ;;  %v586_v45 = vpop.f32.mrf.mxu0  ;;  %v626_v50 = vpop.f32.mrf.mxu1 }
 0x109   : > { %v1669_v53 = vadd.f32 %v1425_v40, %v586_v45  ;;  %v1672_v58 = vadd.f32 %v1425_v40, %v626_v50 }
 0x10a   : > { %1998 = vst [vmem:[#allocation9_spill] sm:$0xff] %v1666_v42 }
 0x10b   : > { %759 = vst [vmem:[%s1430_s23 + $0x158] sm:$0xff] %v1663_v38 }
 0x10c   : > { %775 = vst [vmem:[%s1430_s23 + $0x1d8] sm:$0xff] %v1666_v42 }
 0x10d   : > { %728 = vst [vmem:[%s1430_s23 + $0x60] sm:$0xff] %v1669_v53 }
 0x10e   : > { %744 = vst [vmem:[%s1430_s23 + $0xe0] sm:$0xff] %v1672_v58 }
 0x10f   : > { %v666_v61 = vpop.f32.mrf.mxu2  ;;  %v706_v2 = vpop.f32.mrf.mxu3 }
 0x110   : > { %v1683_v5 = vadd.f32 %v1425_v40, %v666_v61  ;;  %v1686_v10 = vadd.f32 %v1425_v40, %v706_v2  ;;  %v588_v13 = vpop.f32.mrf.mxu0  ;;  %v628_v18 = vpop.f32.mrf.mxu1 }
 0x111   : > { %v1689_v21 = vadd.f32 %v1425_v40, %v588_v13  ;;  %v1692_v26 = vadd.f32 %v1425_v40, %v628_v18 }
 0x112   : > { %1999 = vst [vmem:[#allocation10_spill] sm:$0xff] %v1686_v10 }
 0x113   : > { %760 = vst [vmem:[%s1430_s23 + $0x160] sm:$0xff] %v1683_v5 }
 0x114   : > { %776 = vst [vmem:[%s1430_s23 + $0x1e0] sm:$0xff] %v1686_v10 }
 0x115   : > { %729 = vst [vmem:[%s1430_s23 + $0x68] sm:$0xff] %v1689_v21 }
 0x116   : > { %745 = vst [vmem:[%s1430_s23 + $0xe8] sm:$0xff] %v1692_v26 }
 0x117   : > { %v668_v29 = vpop.f32.mrf.mxu2  ;;  %v708_v34 = vpop.f32.mrf.mxu3 }
 0x118   : > { %v1703_v37 = vadd.f32 %v1425_v40, %v668_v29  ;;  %v1706_v45 = vadd.f32 %v1425_v40, %v708_v34  ;;  %v591_v50 = vpop.f32.mrf.mxu0  ;;  %v631_v61 = vpop.f32.mrf.mxu1 }
 0x119   : > { %v1709_v2 = vadd.f32 %v1425_v40, %v591_v50  ;;  %v1712_v13 = vadd.f32 %v1425_v40, %v631_v61 }
 0x11a   : > { %2000 = vst [vmem:[#allocation11_spill] sm:$0xff] %v1706_v45 }
 0x11b   : > { %761 = vst [vmem:[%s1430_s23 + $0x168] sm:$0xff] %v1703_v37 }
 0x11c   : > { %777 = vst [vmem:[%s1430_s23 + $0x1e8] sm:$0xff] %v1706_v45 }
 0x11d   : > { %730 = vst [vmem:[%s1430_s23 + $0x70] sm:$0xff] %v1709_v2 }
 0x11e   : > { %746 = vst [vmem:[%s1430_s23 + $0xf0] sm:$0xff] %v1712_v13 }
 0x11f   : > { %v671_v18 = vpop.f32.mrf.mxu2  ;;  %v711_v29 = vpop.f32.mrf.mxu3 }
 0x120   : > { %v1723_v34 = vadd.f32 %v1425_v40, %v671_v18  ;;  %v1726_v50 = vadd.f32 %v1425_v40, %v711_v29  ;;  %v593_v61 = vpop.f32.mrf.mxu0  ;;  %v633_v10 = vpop.f32.mrf.mxu1 }
 0x121   : > { %v594_v42 = vadd.f32 %v1425_v40, %v593_v61  ;;  %v1730_v45 = vadd.f32 %v1425_v40, %v633_v10 }
 0x122   : > { %2001 = vst [vmem:[#allocation12_spill] sm:$0xff] %v1726_v50 }
 0x123   : > { %762 = vst [vmem:[%s1430_s23 + $0x170] sm:$0xff] %v1723_v34 }
 0x124   : > { %778 = vst [vmem:[%s1430_s23 + $0x1f0] sm:$0xff] %v1726_v50 }
 0x125   : > { %731 = vst [vmem:[%s1430_s23 + $0x78] sm:$0xff] %v594_v42 }
 0x126   : > { %747 = vst [vmem:[%s1430_s23 + $0xf8] sm:$0xff] %v1730_v45 }
 0x127   : > { %v673_v25 = vpop.f32.mrf.mxu2  ;;  %v713_v18 = vpop.f32.mrf.mxu3 }
 0x128   : > { %v1740_v9 = vadd.f32 %v1425_v40, %v673_v25  ;;  %v1743_v29 = vadd.f32 %v1425_v40, %v713_v18  ;;  %783 = sbr.rel (%p1231_p4) target bundleno = 304 (0x130), region = 36 }
 0x12a   : > { %2002 = vst [vmem:[#allocation13_spill] sm:$0xff] %v1743_v29 }
 0x12b   : > { %763 = vst [vmem:[%s1430_s23 + $0x178] sm:$0xff] %v1740_v9 }
 0x12c   : > { %779 = vst [vmem:[%s1430_s23 + $0x1f8] sm:$0xff] %v1743_v29 }
 0x12d   : > { %v1316_v10 = vmov 0.0  }
 0x12e   : > { %784 = vst [vmem:[%s1965_s4] sm:$0x1] %v1316_v10 }
 0x12f   : > { %785 = vst [vmem:[%s1966_s5] sm:$0x1] %v1316_v10 }
 0x130 PF: > { %v787_v40 = vadd.f32 %v1449_v51, %v1433_v43  ;;  %v859_v25 = vmul.f32 %v1433_v43, %v1433_v43  ;;  %v860_v61 = vmul.f32 %v1449_v51, %v1449_v51  ;;  %v861_v29 = vmul.f32 %v1469_v59, %v1469_v59 }
 0x131   : > { %v862_v10 = vmul.f32 %v1489_v3, %v1489_v3  ;;  %v863_v32 = vmul.f32 %v1509_v11, %v1509_v11  ;;  %v864_v51 = vmul.f32 %v1529_v19, %v1529_v19 }
 0x132   : > { %v788_v18 = vadd.f32 %v787_v40, %v1469_v59  ;;  %v923_v57 = vadd.f32 %v860_v61, %v859_v25 }
 0x134   : > { %v789_v50 = vadd.f32 %v788_v18, %v1489_v3  ;;  %v924_v43 = vadd.f32 %v923_v57, %v861_v29  ;;  %v865_v18 = vmul.f32 %v1549_v27, %v1549_v27 }
 0x136   : > { %v790_v41 = vadd.f32 %v789_v50, %v1509_v11  ;;  %v925_v40 = vadd.f32 %v924_v43, %v862_v10  ;;  %v866_v50 = vmul.f32 %v1569_v35, %v1569_v35  ;;  %v871_v43 = vmul.f32 %v1669_v53, %v1669_v53 }
 0x138   : > { %v791_v24 = vadd.f32 %v790_v41, %v1529_v19  ;;  %v926_v16 = vadd.f32 %v925_v40, %v863_v32  ;;  %v867_v41 = vmul.f32 %v1589_v46, %v1589_v46  ;;  %v869_v32 = vmul.f32 %v1629_v14, %v1629_v14 }
 0x139   : > { %v872_v40 = vmul.f32 %v1689_v21, %v1689_v21 }
 0x13a   : > { %v792_v59 = vadd.f32 %v791_v24, %v1549_v27  ;;  %v927_v25 = vadd.f32 %v926_v16, %v864_v51  ;;  %v868_v24 = vmul.f32 %v1609_v62, %v1609_v62 }
 0x13c   : > { %v793_v3 = vadd.f32 %v792_v59, %v1569_v35  ;;  %v928_v57 = vadd.f32 %v927_v25, %v865_v18  ;;  %v870_v35 = vmul.f32 %v1649_v30, %v1649_v30  ;;  %v873_v18 = vmul.f32 %v1709_v2, %v1709_v2 }
 0x13e   : > { %v794_v11 = vadd.f32 %v793_v3, %v1589_v46  ;;  %v929_v29 = vadd.f32 %v928_v57, %v866_v50  ;;  %v874_v50 = vmul.f32 %v594_v42, %v594_v42 }
 0x140   : > { %v795_v19 = vadd.f32 %v794_v11, %v1609_v62  ;;  %v930_v61 = vadd.f32 %v929_v29, %v867_v41 }
 0x142   : > { %v796_v27 = vadd.f32 %v795_v19, %v1629_v14  ;;  %v931_v10 = vadd.f32 %v930_v61, %v868_v24  ;;  %v879_v61 = vmul.f32 %v1512_v12, %v1512_v12 }
 0x144   : > { %v797_v16 = vadd.f32 %v796_v27, %v1649_v30  ;;  %v932_v51 = vadd.f32 %v931_v10, %v869_v32  ;;  %v878_v27 = vmul.f32 %v1492_v4, %v1492_v4 }
 0x146   : > { %v798_v46 = vadd.f32 %v797_v16, %v1669_v53  ;;  %v933_v59 = vadd.f32 %v932_v51, %v870_v35  ;;  %v875_v53 = vmul.f32 %v1436_v44, %v1436_v44  ;;  %v880_v35 = vmul.f32 %v1532_v20, %v1532_v20 }
 0x147   : > { %v882_v51 = vmul.f32 %v1572_v36, %v1572_v36 }
 0x148   : > { %v799_v62 = vadd.f32 %v798_v46, %v1689_v21  ;;  %v934_v3 = vadd.f32 %v933_v59, %v871_v43  ;;  %v876_v21 = vmul.f32 %v1452_v52, %v1452_v52  ;;  %v881_v46 = vmul.f32 %v1552_v28, %v1552_v28 }
 0x14a   : > { %v800_v14 = vadd.f32 %v799_v62, %v1709_v2  ;;  %v935_v25 = vadd.f32 %v934_v3, %v872_v40  ;;  %v877_v2 = vmul.f32 %v1472_v60, %v1472_v60  ;;  %v883_v40 = vmul.f32 %v1592_v49, %v1592_v49 }
 0x14b   : > { %v885_v3 = vmul.f32 %v1632_v17, %v1632_v17 }
 0x14c   : > { %v801_v30 = vadd.f32 %v800_v14, %v594_v42  ;;  %v936_v41 = vadd.f32 %v935_v25, %v873_v18  ;;  %v884_v14 = vmul.f32 %v1612_v1, %v1612_v1 }
 0x14e   : > { %v802_v11 = vadd.f32 %v801_v30, %v1436_v44  ;;  %v937_v19 = vadd.f32 %v936_v41, %v874_v50  ;;  %v886_v50 = vmul.f32 %v1652_v33, %v1652_v33  ;;  %v888_v41 = vmul.f32 %v1692_v26, %v1692_v26 }
 0x150   : > { %v803_v57 = vadd.f32 %v802_v11, %v1452_v52  ;;  %v938_v29 = vadd.f32 %v937_v19, %v875_v53  ;;  %v887_v11 = vmul.f32 %v1672_v58, %v1672_v58 }
 0x152   : > { %v804_v24 = vadd.f32 %v803_v57, %v1472_v60  ;;  %v939_v32 = vadd.f32 %v938_v29, %v876_v21  ;;  %v889_v21 = vmul.f32 %v1712_v13, %v1712_v13  ;;  %v891_v29 = vmul.f32 %v1443_v47, %v1443_v47 }
 0x154   : > { %v805_v42 = vadd.f32 %v804_v24, %v1492_v4  ;;  %v940_v16 = vadd.f32 %v939_v32, %v877_v2  ;;  %v890_v24 = vmul.f32 %v1730_v45, %v1730_v45 }
 0x156   : > { %v806_v44 = vadd.f32 %v805_v42, %v1512_v12  ;;  %v941_v10 = vadd.f32 %v940_v16, %v878_v27  ;;  %v892_v27 = vmul.f32 %v1463_v55, %v1463_v55  ;;  %v894_v16 = vmul.f32 %v1503_v7, %v1503_v7 }
 0x158   : > { %v807_v52 = vadd.f32 %v806_v44, %v1532_v20  ;;  %v942_v43 = vadd.f32 %v941_v10, %v879_v61  ;;  %v893_v44 = vmul.f32 %v1483_v63, %v1483_v63 }
 0x15a   : > { %v808_v60 = vadd.f32 %v807_v52, %v1552_v28  ;;  %v943_v62 = vadd.f32 %v942_v43, %v880_v35  ;;  %v895_v35 = vmul.f32 %v1523_v15, %v1523_v15  ;;  %v897_v43 = vmul.f32 %v1563_v31, %v1563_v31 }
 0x15c   : > { %v809_v4 = vadd.f32 %v808_v60, %v1572_v36  ;;  %v944_v59 = vadd.f32 %v943_v62, %v881_v46  ;;  %v896_v60 = vmul.f32 %v1543_v23, %v1543_v23 }
 0x15e   : > { %v810_v12 = vadd.f32 %v809_v4, %v1592_v49  ;;  %v945_v18 = vadd.f32 %v944_v59, %v882_v51  ;;  %v898_v51 = vmul.f32 %v1583_v39, %v1583_v39  ;;  %v900_v59 = vmul.f32 %v1623_v6, %v1623_v6 }
 0x160   : > { %v811_v20 = vadd.f32 %v810_v12, %v1612_v1  ;;  %v946_v30 = vadd.f32 %v945_v18, %v883_v40  ;;  %v899_v12 = vmul.f32 %v1603_v54, %v1603_v54 }
 0x162   : > { %v812_v28 = vadd.f32 %v811_v20, %v1632_v17  ;;  %v947_v25 = vadd.f32 %v946_v30, %v884_v14  ;;  %v901_v14 = vmul.f32 %v1643_v22, %v1643_v22  ;;  %v903_v30 = vmul.f32 %v1683_v5, %v1683_v5 }
 0x164   : > { %v813_v36 = vadd.f32 %v812_v28, %v1652_v33  ;;  %v948_v53 = vadd.f32 %v947_v25, %v885_v3  ;;  %v902_v28 = vmul.f32 %v1663_v38, %v1663_v38 }
 0x166   : > { %v814_v49 = vadd.f32 %v813_v36, %v1672_v58  ;;  %v949_v57 = vadd.f32 %v948_v53, %v886_v50  ;;  %v904_v50 = vmul.f32 %v1703_v37, %v1703_v37  ;;  %v906_v53 = vmul.f32 %v1740_v9, %v1740_v9 }
 0x168   : > { %v815_v1 = vadd.f32 %v814_v49, %v1692_v26  ;;  %v950_v19 = vadd.f32 %v949_v57, %v887_v11  ;;  %v905_v49 = vmul.f32 %v1723_v34, %v1723_v34 }
 0x16a   : > { %v816_v17 = vadd.f32 %v815_v1, %v1712_v13  ;;  %v951_v2 = vadd.f32 %v950_v19, %v888_v41  ;;  %v907_v41 = vmul.f32 %v1446_v48, %v1446_v48  ;;  %v909_v19 = vmul.f32 %v1486_v0, %v1486_v0 }
 0x16c   : > { %v817_v33 = vadd.f32 %v816_v17, %v1730_v45  ;;  %v952_v42 = vadd.f32 %v951_v2, %v889_v21  ;;  %v908_v17 = vmul.f32 %v1466_v56, %v1466_v56 }
 0x16e   : > { %v818_v58 = vadd.f32 %v817_v33, %v1443_v47  ;;  %v953_v32 = vadd.f32 %v952_v42, %v890_v24  ;;  %v910_v24 = vmul.f32 %v1506_v8, %v1506_v8 }
 0x170   : > { %v819_v26 = vadd.f32 %v818_v58, %v1463_v55  ;;  %v954_v61 = vadd.f32 %v953_v32, %v891_v29 }
 0x172   : > { %v820_v13 = vadd.f32 %v819_v26, %v1483_v63  ;;  %v955_v52 = vadd.f32 %v954_v61, %v892_v27 }
 0x174   : > { %v821_v45 = vadd.f32 %v820_v13, %v1503_v7  ;;  %v956_v10 = vadd.f32 %v955_v52, %v893_v44 }
 0x176   : > { %v822_v47 = vadd.f32 %v821_v45, %v1523_v15  ;;  %v957_v46 = vadd.f32 %v956_v10, %v894_v16 }
 0x178   : > { %v823_v55 = vadd.f32 %v822_v47, %v1543_v23  ;;  %v958_v4 = vadd.f32 %v957_v46, %v895_v35  ;;  %v2007_v47 = vld [vmem:[#allocation6_spill] sm:$0xff] }
 0x179   : > { %v915_v10 = vmul.f32 %v2007_v47, %v2007_v47 }
 0x17a   : > { %v824_v63 = vadd.f32 %v823_v55, %v1563_v31  ;;  %v959_v62 = vadd.f32 %v958_v4, %v896_v60  ;;  %v2008_v60 = vld [vmem:[#allocation7_spill] sm:$0xff]  ;;  %v2009_v4 = vld [vmem:[#allocation8_spill] sm:$0xff] }
 0x17c   : > { %v825_v7 = vadd.f32 %v824_v63, %v1583_v39  ;;  %v960_v40 = vadd.f32 %v959_v62, %v897_v43  ;;  %v916_v63 = vmul.f32 %v2008_v60, %v2008_v60 }
 0x17e   : > { %v826_v15 = vadd.f32 %v825_v7, %v1603_v54  ;;  %v961_v20 = vadd.f32 %v960_v40, %v898_v51  ;;  %v917_v51 = vmul.f32 %v2009_v4, %v2009_v4 }
 0x180   : > { %v827_v23 = vadd.f32 %v826_v15, %v1623_v6  ;;  %v962_v18 = vadd.f32 %v961_v20, %v899_v12  ;;  %v2010_v15 = vld [vmem:[#allocation9_spill] sm:$0xff] }
 0x181   : > { %v918_v40 = vmul.f32 %v2010_v15, %v2010_v15 }
 0x182   : > { %v828_v31 = vadd.f32 %v827_v23, %v1643_v22  ;;  %v963_v3 = vadd.f32 %v962_v18, %v900_v59  ;;  %v2011_v59 = vld [vmem:[#allocation10_spill] sm:$0xff]  ;;  %v2012_v18 = vld [vmem:[#allocation11_spill] sm:$0xff] }
 0x184   : > { %v829_v39 = vadd.f32 %v828_v31, %v1663_v38  ;;  %v964_v36 = vadd.f32 %v963_v3, %v901_v14  ;;  %v919_v31 = vmul.f32 %v2011_v59, %v2011_v59 }
 0x186   : > { %v830_v54 = vadd.f32 %v829_v39, %v1683_v5  ;;  %v965_v25 = vadd.f32 %v964_v36, %v902_v28  ;;  %v920_v28 = vmul.f32 %v2012_v18, %v2012_v18 }
 0x188   : > { %v831_v6 = vadd.f32 %v830_v54, %v1703_v37  ;;  %v966_v11 = vadd.f32 %v965_v25, %v903_v30  ;;  %v2013_v54 = vld [vmem:[#allocation12_spill] sm:$0xff] }
 0x189   : > { %v921_v36 = vmul.f32 %v2013_v54, %v2013_v54 }
 0x18a   : > { %v832_v22 = vadd.f32 %v831_v6, %v1723_v34  ;;  %v967_v1 = vadd.f32 %v966_v11, %v904_v50  ;;  %v2014_v50 = vld [vmem:[#allocation13_spill] sm:$0xff] }
 0x18c   : > { %v833_v38 = vadd.f32 %v832_v22, %v1740_v9  ;;  %v968_v57 = vadd.f32 %v967_v1, %v905_v49  ;;  %v922_v22 = vmul.f32 %v2014_v50, %v2014_v50 }
 0x18e   : > { %v834_v5 = vadd.f32 %v833_v38, %v1446_v48  ;;  %v969_v21 = vadd.f32 %v968_v57, %v906_v53  ;;  %v2003_v48 = vld [vmem:[#allocation2_spill] sm:$0xff] }
 0x18f   : > { %v911_v29 = vmul.f32 %v2003_v48, %v2003_v48 }
 0x190   : > { %v835_v37 = vadd.f32 %v834_v5, %v1466_v56  ;;  %v970_v33 = vadd.f32 %v969_v21, %v907_v41  ;;  %v2004_v56 = vld [vmem:[#allocation3_spill] sm:$0xff]  ;;  %v786_v21 = vld [vmem:[%s1965_s4] sm:$0x1] }
 0x191   : > { %v912_v27 = vmul.f32 %v2004_v56, %v2004_v56 }
 0x192   : > { %v836_v34 = vadd.f32 %v835_v37, %v1486_v0  ;;  %v971_v2 = vadd.f32 %v970_v33, %v908_v17  ;;  %v2005_v0 = vld [vmem:[#allocation4_spill] sm:$0xff] }
 0x193   : > { %v913_v44 = vmul.f32 %v2005_v0, %v2005_v0 }
 0x194   : > { %v837_v9 = vadd.f32 %v836_v34, %v1506_v8  ;;  %v972_v42 = vadd.f32 %v971_v2, %v909_v19  ;;  %v2006_v8 = vld [vmem:[#allocation5_spill] sm:$0xff]  ;;  %v858_v2 = vld [vmem:[%s1966_s5] sm:$0x1] }
 0x195   : > { %v914_v16 = vmul.f32 %v2006_v8, %v2006_v8 }
 0x196   : > { %v838_v58 = vadd.f32 %v837_v9, %v2003_v48  ;;  %v973_v32 = vadd.f32 %v972_v42, %v910_v24 }
 0x198   : > { %v839_v26 = vadd.f32 %v838_v58, %v2004_v56  ;;  %v974_v61 = vadd.f32 %v973_v32, %v911_v29 }
 0x19a   : > { %v840_v13 = vadd.f32 %v839_v26, %v2005_v0  ;;  %v975_v52 = vadd.f32 %v974_v61, %v912_v27 }
 0x19c   : > { %v841_v45 = vadd.f32 %v840_v13, %v2006_v8  ;;  %v976_v55 = vadd.f32 %v975_v52, %v913_v44 }
 0x19e   : > { %v842_v35 = vadd.f32 %v841_v45, %v2007_v47  ;;  %v977_v43 = vadd.f32 %v976_v55, %v914_v16 }
 0x1a0   : > { %v843_v46 = vadd.f32 %v842_v35, %v2008_v60  ;;  %v978_v62 = vadd.f32 %v977_v43, %v915_v10 }
 0x1a2   : > { %v844_v7 = vadd.f32 %v843_v46, %v2009_v4  ;;  %v979_v23 = vadd.f32 %v978_v62, %v916_v63 }
 0x1a4   : > { %v845_v12 = vadd.f32 %v844_v7, %v2010_v15  ;;  %v980_v14 = vadd.f32 %v979_v23, %v917_v51 }
 0x1a6   : > { %v846_v20 = vadd.f32 %v845_v12, %v2011_v59  ;;  %v981_v3 = vadd.f32 %v980_v14, %v918_v40 }
 0x1a8   : > { %v847_v39 = vadd.f32 %v846_v20, %v2012_v18  ;;  %v982_v6 = vadd.f32 %v981_v3, %v919_v31 }
 0x1aa   : > { %v848_v30 = vadd.f32 %v847_v39, %v2013_v54  ;;  %v983_v49 = vadd.f32 %v982_v6, %v920_v28 }
 0x1ac   : > { %v849_v25 = vadd.f32 %v848_v30, %v2014_v50  ;;  %v984_v38 = vadd.f32 %v983_v49, %v921_v36 }
 0x1ae   : > { %v850_v11 = vrot.slane %v849_v25, 4  ;;  %v985_v1 = vadd.f32 %v984_v38, %v922_v22 }
 0x1b0   : > { %v851_v53 = vadd.f32 %v850_v11, %v849_v25  ;;  %v986_v41 = vrot.slane %v985_v1, 4 }
 0x1b2   : > { %v852_v5 = vrot.slane %v851_v53, 2  ;;  %v987_v37 = vadd.f32 %v986_v41, %v985_v1 }
 0x1b4   : > { %v853_v57 = vadd.f32 %v852_v5, %v851_v53  ;;  %v988_v34 = vrot.slane %v987_v37, 2 }
 0x1b6   : > { %v854_v17 = vrot.slane %v853_v57, 1  ;;  %v989_v33 = vadd.f32 %v988_v34, %v987_v37 }
 0x1b8   : > { %v855_v19 = vadd.f32 %v854_v17, %v853_v57  ;;  %v990_v24 = vrot.slane %v989_v33, 1 }
 0x1ba   : > { %v856_v9 = vadd.f32 %v855_v19, %v786_v21  ;;  %v991_v48 = vadd.f32 %v990_v24, %v989_v33 }
 0x1bc   : > { %857 = vst [vmem:[%s1965_s4] sm:$0x1] %v856_v9  ;;  %v992_v58 = vadd.f32 %v991_v48, %v858_v2 }
 0x1be   : > { %993 = vst [vmem:[%s1966_s5] sm:$0x1] %v992_v58 }
 0x1bf PF: > { %s16_s18 = sadd.s32 1, %s1314_s18  }
 0x1c0   : > { %p13_p5 = scmp.ge.s32.totalorder %s16_s18, 4  }
 0x1c2   :  { %15 = sbr.rel (!%p13_p5) target bundleno = 1 (0x1), region = 82 }

</bundles_post_ra>
